<compile_context>
chip_gen: v7x
topology: tpu7x:2x2x1
jax: 0.10.0
libtpu: 0.0.40
codegen_flags: <defaults>
</compile_context>

<pallas_src>
import jax
import jax.numpy as jnp
from jax.experimental import pallas as pl
from jax.experimental.pallas import tpu as pltpu

# ----------------------------- configuration --------------------------------
B = 2            # number of images
N_ROIS = 4       # number of rois (sorted by batch index, as mmdet assumes)
SEM_IN = 8       # semantic_in_channel
SEM_OUT = 8      # semantic_out_channel
INS_IN = 8       # instance_in_channel
INS_OUT = 8      # instance_out_channel
OUT_SIZE = 8     # roi / instance spatial size (module default 14; small here)
HS = WS = 16     # semantic feature map spatial size
STRIDE = 4       # semantic_out_stride
DILATIONS = (1, 3, 5)


# ------------------------------ fused kernel ---------------------------------
def _sfm_fused_kernel(bidx_ref,                       # scalar prefetch (SMEM)
                      st_ref, sem_ref, ins_ref, logit_ref,
                      wsem_ref, bsem_ref,
                      wf1_ref, wf1l_ref, bf1_ref,
                      wmbf_ref, bmbf_ref, mstk_ref,
                      wmrg_ref, bmrg_ref,
                      wout_ref, bout_ref,
                      ut_ref,
                      o_ref):
    """Whole SFM stage for one roi.  Channels live on sublanes, flattened
    spatial positions on lanes, so every conv is a clean MXU matmul and the
    output is written lane-dense."""
    del bidx_ref                                     # consumed by index_maps
    C = ins_ref.shape[1]
    P = ins_ref.shape[2]
    n_dil = mstk_ref.shape[0]
    f32 = jnp.float32

    # 1) semantic_transform_in (1x1 conv) + ReLU on this roi's image.
    sem = sem_ref[0]                                                  # (Cs, HW)
    sem_t = jnp.dot(wsem_ref[...], sem, preferred_element_type=f32)
    sem_t = jnp.maximum(sem_t + bsem_ref[...], 0.0)                   # (SEM_OUT, HW)

    # 2) SimpleRoIAlign: bilinear point sampling as one matmul with the
    #    precomputed per-roi sampling matrix (K = HW = 256).
    roi_sem = jnp.dot(sem_t, st_ref[0], preferred_element_type=f32)   # (SEM_OUT, P)

    # 3) fuse_conv[0]: 1x1 over concat([inst, roi_sem, sigmoid(logits)]) + ReLU.
    #    The logit channel is applied as a rank-1 term (no HBM concat needed).
    sig_logit = jax.nn.sigmoid(logit_ref[0])                          # (1, P)
    xcat = jnp.concatenate([ins_ref[0], roi_sem], axis=0)             # (C+SEM_OUT, P)
    x = jnp.dot(wf1_ref[...], xcat, preferred_element_type=f32)
    x = x + wf1l_ref[...] * sig_logit + bf1_ref[...]
    x = jnp.maximum(x, 0.0)                                           # (C, P)

    # 4) MultiBranchFusion: for each dilation, channel-mix all 9 taps in one
    #    dot, then gather/sum the taps spatially with a precomputed 0/1 shift
    #    matrix (zero padding baked in); per-branch ReLU, sum, 1x1 merge, ReLU.
    taps = jnp.dot(wmbf_ref[...], x, preferred_element_type=f32)      # (D*9*C, P)
    acc = jnp.zeros((C, P), f32)
    for di in range(n_dil):
        yd = taps[di * 9 * C:(di + 1) * 9 * C]                        # (9C, P)
        z = jnp.concatenate([yd[t * C:(t + 1) * C] for t in range(9)],
                            axis=1)                                   # (C, 9P)
        br = jnp.dot(z, mstk_ref[di], preferred_element_type=f32)     # (C, P)
        acc = acc + jnp.maximum(br + bmbf_ref[di], 0.0)
    x = jnp.dot(wmrg_ref[...], acc, preferred_element_type=f32) + bmrg_ref[...]
    x = jnp.maximum(x, 0.0)                                           # (C, P)

    # 5) fuse_transform_out (1x1 conv to INS_OUT-1) + ReLU.
    x7 = jnp.dot(wout_ref[...], x, preferred_element_type=f32) + bout_ref[...]
    x7 = jnp.maximum(x7, 0.0)                                         # (INS_OUT-1, P)

    # 6) concat sigmoid(logits) channel + bilinear 2x upsample: one matmul per
    #    channel group with the precomputed kron(A, A)^T matrix.  Output block
    #    is lane-dense (last dim = 4P).
    up_main = jnp.dot(x7, ut_ref[...], preferred_element_type=f32)    # (INS_OUT-1, 4P)
    up_logit = jnp.dot(sig_logit, ut_ref[...], preferred_element_type=f32)  # (1, 4P)
    o_ref[0, :x7.shape[0], :] = up_main
    o_ref[0, x7.shape[0]:, :] = up_logit


# --------------------------- precomputed operators ---------------------------
def build_roi_sampling_matrix(rois, Hs, Ws, out_size, spatial_scale):
    """Dense bilinear point-sampling matrix S: (N, out^2, Hs*Ws).  Matches mmcv
    SimpleRoIAlign (point_sample / grid_sample align_corners=False, zero
    padding outside the feature map)."""
    os_ = out_size
    P = os_ * os_
    x1, y1, x2, y2 = rois[:, 1], rois[:, 2], rois[:, 3], rois[:, 4]
    idx = (jnp.arange(os_, dtype=jnp.float32) + 0.5) / os_
    gy, gx = jnp.meshgrid(idx, idx, indexing='ij')            # p = i*os + j
    rel_x = gx.reshape(-1)
    rel_y = gy.reshape(-1)
    abs_x = x1[:, None] + rel_x[None, :] * (x2 - x1)[:, None]  # (N, P)
    abs_y = y1[:, None] + rel_y[None, :] * (y2 - y1)[:, None]
    px = abs_x * spatial_scale - 0.5
    py = abs_y * spatial_scale - 0.5
    x0 = jnp.floor(px)
    y0 = jnp.floor(py)
    wx1 = px - x0
    wy1 = py - y0
    x0i = x0.astype(jnp.int32)
    y0i = y0.astype(jnp.int32)
    S = jnp.zeros((rois.shape[0], P, Hs * Ws), jnp.float32)
    for dy, wy in ((0, 1.0 - wy1), (1, wy1)):
        for dx, wx in ((0, 1.0 - wx1), (1, wx1)):
            xi = x0i + dx
            yi = y0i + dy
            valid = (xi >= 0) & (xi < Ws) & (yi >= 0) & (yi < Hs)
            wgt = jnp.where(valid, wy * wx, 0.0)
            flat = jnp.clip(yi, 0, Hs - 1) * Ws + jnp.clip(xi, 0, Ws - 1)
            onehot = jax.nn.one_hot(flat, Hs * Ws, dtype=jnp.float32)
            S = S + wgt[..., None] * onehot
    return S


def build_shift_stack(h, w, dilations):
    """Per-dilation stacked 0/1 tap matrices M: (D, 9*P, P) with
    M[d, t*P + q, p] = 1 iff source pixel q = (i+(ki-1)*d, j+(kj-1)*d) of
    output pixel p = (i, j) is in-bounds (zero padding otherwise), t = ki*3+kj.
    Then a whole dilated 3x3 conv is (channel-mixed taps (C, 9P)) @ M[d]."""
    P = h * w
    ii = jnp.arange(h)
    jj = jnp.arange(w)
    gi, gj = jnp.meshgrid(ii, jj, indexing='ij')
    mats = []
    for d in dilations:
        taps = []
        for ki in range(3):
            for kj in range(3):
                si = gi + (ki - 1) * d
                sj = gj + (kj - 1) * d
                valid = ((si >= 0) & (si < h) & (sj >= 0) & (sj < w))
                valid = valid.reshape(-1).astype(jnp.float32)
                q = (jnp.clip(si, 0, h - 1) * w
                     + jnp.clip(sj, 0, w - 1)).reshape(-1)
                m = jax.nn.one_hot(q, P, dtype=jnp.float32) * valid[:, None]
                taps.append(m.T)                     # rows = source q, cols = p
        mats.append(jnp.concatenate(taps, axis=0))   # (9P, P)
    return jnp.stack(mats, axis=0)                   # (D, 9P, P)


def bilinear_upsample_matrix(Hin, scale=2):
    """1-D interpolation matrix matching nn.Upsample(bilinear, align_corners=False)."""
    Hout = Hin * scale
    dst = jnp.arange(Hout, dtype=jnp.float32)
    src = jnp.maximum((dst + 0.5) / scale - 0.5, 0.0)
    i0 = jnp.floor(src).astype(jnp.int32)
    i1 = jnp.minimum(i0 + 1, Hin - 1)
    w1 = src - i0.astype(jnp.float32)
    w0 = 1.0 - w1
    A = jnp.zeros((Hout, Hin), jnp.float32)
    A = A.at[jnp.arange(Hout), i0].add(w0)
    A = A.at[jnp.arange(Hout), i1].add(w1)
    return A


# ------------------------------ params & wrapper ------------------------------
def init_params(key):
    ks = jax.random.split(key, 12)
    C = INS_IN
    D = len(DILATIONS)

    def kaiming(k, shape, fan_out):
        return jax.random.normal(k, shape, jnp.float32) * jnp.sqrt(2.0 / fan_out)

    def bias(k, shape):
        return 0.1 * jax.random.normal(k, shape, jnp.float32)

    p = {}
    # all 1x1 convs stored in (Cout, Cin) matmul form (channels-first layout)
    p['w_sem_t'] = kaiming(ks[0], (SEM_OUT, SEM_IN), SEM_OUT)
    p['b_sem'] = bias(ks[1], (SEM_OUT, 1))
    p['w_f1_t'] = kaiming(ks[2], (C, C + SEM_OUT), C)       # inst + roi_sem part
    p['w_f1_log'] = kaiming(ks[3], (C, 1), C)               # sigmoid(logit) part
    p['b_f1'] = bias(ks[4], (C, 1))
    # MultiBranchFusion: 3 dilated 3x3 convs + 1x1 merge conv
    p['w_dil'] = kaiming(ks[5], (D, 3, 3, C, C), C * 9)     # (D, kh, kw, Cin, Cout)
    p['b_dil'] = bias(ks[6], (D, C, 1))
    p['w_merge_t'] = kaiming(ks[7], (C, C), C)
    p['b_merge'] = bias(ks[8], (C, 1))
    p['w_out_t'] = kaiming(ks[9], (INS_OUT - 1, C), INS_OUT - 1)
    p['b_out'] = bias(ks[10], (INS_OUT - 1, 1))
    # stacked channel-mix weight for the kernel: row (di*9 + ki*3+kj)*C + cout
    p['w_mbf_stk'] = jnp.transpose(p['w_dil'], (0, 1, 2, 4, 3)).reshape(D * 9 * C, C)
    return p


@jax.jit
def sfm_forward(instance_feats, instance_logits, semantic_feat, rois, params):
    N, Ci, h, w = instance_feats.shape
    Bq, Cs, Hs, Ws = semantic_feat.shape
    P = h * w
    HW = Hs * Ws
    Ho, Wo = 2 * h, 2 * w
    D = len(DILATIONS)

    # channels-first flattened views: pure reshapes, no NCHW transposes.
    sem_cf = semantic_feat.reshape(Bq, Cs, HW)
    ins_cf = instance_feats.reshape(N, Ci, P)
    logit_cf = instance_logits.reshape(N, 1, P)

    # precomputed dense operators (tiny; built once inside the jit).
    S = build_roi_sampling_matrix(rois, Hs, Ws, h, 1.0 / STRIDE)      # (N, P, HW)
    ST = jnp.transpose(S, (0, 2, 1))                                  # (N, HW, P)
    batch_idx = rois[:, 0].astype(jnp.int32)
    mstk = build_shift_stack(h, w, DILATIONS)                         # (D, 9P, P)
    A = bilinear_upsample_matrix(h, 2)                                # (Ho, h)
    UT = jnp.kron(A, A).T                                             # (P, Ho*Wo)

    grid_spec = pltpu.PrefetchScalarGridSpec(
        num_scalar_prefetch=1,
        grid=(N,),
        in_specs=[
            pl.BlockSpec((1, HW, P), lambda n, b: (n, 0, 0)),         # ST
            pl.BlockSpec((1, Cs, HW), lambda n, b: (b[n], 0, 0)),     # sem_cf
            pl.BlockSpec((1, Ci, P), lambda n, b: (n, 0, 0)),         # ins_cf
            pl.BlockSpec((1, 1, P), lambda n, b: (n, 0, 0)),          # logit_cf
            pl.BlockSpec((SEM_OUT, Cs), lambda n, b: (0, 0)),         # w_sem_t
            pl.BlockSpec((SEM_OUT, 1), lambda n, b: (0, 0)),          # b_sem
            pl.BlockSpec((Ci, Ci + SEM_OUT), lambda n, b: (0, 0)),    # w_f1_t
            pl.BlockSpec((Ci, 1), lambda n, b: (0, 0)),               # w_f1_log
            pl.BlockSpec((Ci, 1), lambda n, b: (0, 0)),               # b_f1
            pl.BlockSpec((D * 9 * Ci, Ci), lambda n, b: (0, 0)),      # w_mbf_stk
            pl.BlockSpec((D, Ci, 1), lambda n, b: (0, 0, 0)),         # b_dil
            pl.BlockSpec((D, 9 * P, P), lambda n, b: (0, 0, 0)),      # shift mats
            pl.BlockSpec((Ci, Ci), lambda n, b: (0, 0)),              # w_merge_t
            pl.BlockSpec((Ci, 1), lambda n, b: (0, 0)),               # b_merge
            pl.BlockSpec((INS_OUT - 1, Ci), lambda n, b: (0, 0)),     # w_out_t
            pl.BlockSpec((INS_OUT - 1, 1), lambda n, b: (0, 0)),      # b_out
            pl.BlockSpec((P, Ho * Wo), lambda n, b: (0, 0)),          # UT
        ],
        out_specs=pl.BlockSpec((1, INS_OUT, Ho * Wo), lambda n, b: (n, 0, 0)),
    )

    out = pl.pallas_call(
        _sfm_fused_kernel,
        grid_spec=grid_spec,
        out_shape=jax.ShapeDtypeStruct((N, INS_OUT, Ho * Wo), jnp.float32),
        compiler_params=pltpu.CompilerParams(
            dimension_semantics=("parallel",)),   # rois split across v7x's 2 TCs
    )(batch_idx, ST, sem_cf, ins_cf, logit_cf,
      params['w_sem_t'], params['b_sem'],
      params['w_f1_t'], params['w_f1_log'], params['b_f1'],
      params['w_mbf_stk'], params['b_dil'], mstk,
      params['w_merge_t'], params['b_merge'],
      params['w_out_t'], params['b_out'],
      UT)

    return out.reshape(N, INS_OUT, Ho, Wo)          # NCHW via pure reshape


# ------------------------- plain-JAX reference (check) ------------------------
@jax.jit
def sfm_reference(instance_feats, instance_logits, semantic_feat, rois, params):
    """NCHW reference of the PyTorch forward; dilated convs use explicit
    pad+slice and the upsample is separable, so it independently validates the
    kernel's shift-matrix / kron reformulations."""
    hp = jax.lax.Precision.HIGHEST
    N, Ci, h, w = instance_feats.shape
    Bq, Cs, Hs, Ws = semantic_feat.shape
    P = h * w

    sem = semantic_feat.reshape(Bq, Cs, Hs * Ws)
    sem_t = jnp.einsum('oc,bcq->boq', params['w_sem_t'], sem, precision=hp)
    sem_t = jnp.maximum(sem_t + params['b_sem'][None], 0.0)

    S = build_roi_sampling_matrix(rois, Hs, Ws, h, 1.0 / STRIDE)
    bidx = rois[:, 0].astype(jnp.int32)
    roi_sem = jnp.einsum('npq,ncq->ncp', S, sem_t[bidx], precision=hp)

    sig = jax.nn.sigmoid(instance_logits.reshape(N, 1, P))
    xcat = jnp.concatenate([instance_feats.reshape(N, Ci, P), roi_sem], axis=1)
    x = jnp.einsum('ok,nkp->nop', params['w_f1_t'], xcat, precision=hp)
    x = x + params['w_f1_log'][None] * sig + params['b_f1'][None]
    x = jnp.maximum(x, 0.0).reshape(N, Ci, h, w)

    pad = max(DILATIONS)
    xp = jnp.pad(x, ((0, 0), (0, 0), (pad, pad), (pad, pad)))
    acc = jnp.zeros_like(x)
    for di, d in enumerate(DILATIONS):
        br = jnp.zeros_like(x)
        for ki in range(3):
            for kj in range(3):
                r0 = pad + (ki - 1) * d
                c0 = pad + (kj - 1) * d
                win = xp[:, :, r0:r0 + h, c0:c0 + w]
                br = br + jnp.einsum('io,nihw->nohw',
                                     params['w_dil'][di, ki, kj], win, precision=hp)
        br = br + params['b_dil'][di].reshape(1, Ci, 1, 1)
        acc = acc + jnp.maximum(br, 0.0)
    x = jnp.einsum('oc,nchw->nohw', params['w_merge_t'], acc, precision=hp)
    x = jnp.maximum(x + params['b_merge'].reshape(1, Ci, 1, 1), 0.0)

    x7 = jnp.einsum('oc,nchw->nohw', params['w_out_t'], x, precision=hp)
    x7 = jnp.maximum(x7 + params['b_out'].reshape(1, -1, 1, 1), 0.0)

    x8 = jnp.concatenate([x7, jax.nn.sigmoid(instance_logits)], axis=1)
    A = bilinear_upsample_matrix(h, 2)
    t = jnp.einsum('oi,ncij->ncoj', A, x8, precision=hp)
    return jnp.einsum('pj,ncoj->ncop', A, t, precision=hp)


# ----------------------------------- main --------------------------------------
if __name__ == "__main__":
    key = jax.random.PRNGKey(0)
    k1, k2, k3, kp = jax.random.split(key, 4)

    instance_feats = jax.random.normal(k1, (N_ROIS, INS_IN, OUT_SIZE, OUT_SIZE),
                                       jnp.float32)
    instance_logits = jax.random.normal(k2, (N_ROIS, 1, OUT_SIZE, OUT_SIZE),
                                        jnp.float32)
    semantic_feat = jax.random.normal(k3, (B, SEM_IN, HS, WS), jnp.float32)
    # rois: (batch_idx, x1, y1, x2, y2) in image coords (image = 64x64), sorted
    # by batch index (mmdet's SimpleRoIAlign assumes batch-sorted rois).
    rois = jnp.array([
        [0.0, 4.0, 6.0, 40.0, 50.0],
        [0.0, 10.0, 2.0, 62.0, 30.0],
        [1.0, 0.0, 0.0, 63.0, 63.0],
        [1.0, 20.0, 16.0, 44.0, 60.0],
    ], dtype=jnp.float32)

    params = init_params(kp)

    out = sfm_forward(instance_feats, instance_logits, semantic_feat, rois, params)
    out = jax.block_until_ready(out)
    assert out.shape == (N_ROIS, INS_OUT, 2 * OUT_SIZE, 2 * OUT_SIZE), out.shape
    assert out.dtype == jnp.float32

    # self-check against the plain-JAX reference (loose tolerance covers MXU
    # matmul precision differences; structural bugs would be O(1) off).
    ref = jax.block_until_ready(
        sfm_reference(instance_feats, instance_logits, semantic_feat, rois, params))
    err = float(jnp.max(jnp.abs(out - ref)) / (jnp.max(jnp.abs(ref)) + 1e-6))
    assert err < 5e-2, f"kernel/reference mismatch: rel-to-max error {err}"

    print("KERNEL_OK")
</pallas_src>

<mosaic_0001>
module attributes {stable_mosaic.version = 11 : i64} {
  func.func private @main(%arg0: i32) attributes {dimension_semantics = [#tpu.dimension_semantics<core_parallel>], iteration_bounds = array<i64: 2>, tpu.core_type = #tpu.core_type<sc_scalar_subcore>, window_params = []} {
    return
  }
}

module attributes {stable_mosaic.version = 11 : i64} {
  func.func private @main(%arg0: i32) attributes {dimension_semantics = [#tpu.dimension_semantics<core_parallel>], iteration_bounds = array<i64: 2>, tpu.core_type = #tpu.core_type<sc_scalar_subcore>, window_params = []} {
    return
  }
}

module attributes {stable_mosaic.version = 11 : i64} {
  func.func @_sfm_fused_kernel(%arg0: i32, %arg1: memref<4xi32, #tpu.memory_space<smem>>, %arg2: memref<1x256x64xf32, #tpu.memory_space<vmem>>, %arg3: memref<1x8x256xf32, #tpu.memory_space<vmem>>, %arg4: memref<1x8x64xf32, #tpu.memory_space<vmem>>, %arg5: memref<1x1x64xf32, #tpu.memory_space<vmem>>, %arg6: memref<8x8xf32, #tpu.memory_space<vmem>>, %arg7: memref<8x1xf32, #tpu.memory_space<vmem>>, %arg8: memref<8x16xf32, #tpu.memory_space<vmem>>, %arg9: memref<8x1xf32, #tpu.memory_space<vmem>>, %arg10: memref<8x1xf32, #tpu.memory_space<vmem>>, %arg11: memref<216x8xf32, #tpu.memory_space<vmem>>, %arg12: memref<3x8x1xf32, #tpu.memory_space<vmem>>, %arg13: memref<3x576x64xf32, #tpu.memory_space<vmem>>, %arg14: memref<8x8xf32, #tpu.memory_space<vmem>>, %arg15: memref<8x1xf32, #tpu.memory_space<vmem>>, %arg16: memref<7x8xf32, #tpu.memory_space<vmem>>, %arg17: memref<7x1xf32, #tpu.memory_space<vmem>>, %arg18: memref<64x256xf32, #tpu.memory_space<vmem>>, %arg19: memref<1x8x256xf32, #tpu.memory_space<vmem>>) attributes {dimension_semantics = [#tpu.dimension_semantics<parallel>], iteration_bounds = array<i64: 4>, scalar_prefetch = 1 : i64, scratch_operands = 0 : i64, tpu.core_type = #tpu.core_type<tc>, window_params = [{transform_indices = @transform_0, window_bounds = array<i64: 1, 256, 64>}, {transform_indices = @transform_1, window_bounds = array<i64: 1, 8, 256>}, {transform_indices = @transform_2, window_bounds = array<i64: 1, 8, 64>}, {transform_indices = @transform_3, window_bounds = array<i64: 1, 1, 64>}, {pipeline_mode = #tpu.pipeline_mode<synchronous>, transform_indices = @transform_4, window_bounds = array<i64: 8, 8>}, {pipeline_mode = #tpu.pipeline_mode<synchronous>, transform_indices = @transform_5, window_bounds = array<i64: 8, 1>}, {pipeline_mode = #tpu.pipeline_mode<synchronous>, transform_indices = @transform_6, window_bounds = array<i64: 8, 16>}, {pipeline_mode = #tpu.pipeline_mode<synchronous>, transform_indices = @transform_7, window_bounds = array<i64: 8, 1>}, {pipeline_mode = #tpu.pipeline_mode<synchronous>, transform_indices = @transform_8, window_bounds = array<i64: 8, 1>}, {pipeline_mode = #tpu.pipeline_mode<synchronous>, transform_indices = @transform_9, window_bounds = array<i64: 216, 8>}, {pipeline_mode = #tpu.pipeline_mode<synchronous>, transform_indices = @transform_10, window_bounds = array<i64: 3, 8, 1>}, {pipeline_mode = #tpu.pipeline_mode<synchronous>, transform_indices = @transform_11, window_bounds = array<i64: 3, 576, 64>}, {pipeline_mode = #tpu.pipeline_mode<synchronous>, transform_indices = @transform_12, window_bounds = array<i64: 8, 8>}, {pipeline_mode = #tpu.pipeline_mode<synchronous>, transform_indices = @transform_13, window_bounds = array<i64: 8, 1>}, {pipeline_mode = #tpu.pipeline_mode<synchronous>, transform_indices = @transform_14, window_bounds = array<i64: 7, 8>}, {pipeline_mode = #tpu.pipeline_mode<synchronous>, transform_indices = @transform_15, window_bounds = array<i64: 7, 1>}, {pipeline_mode = #tpu.pipeline_mode<synchronous>, transform_indices = @transform_16, window_bounds = array<i64: 64, 256>}, {transform_indices = @transform_17, window_bounds = array<i64: 1, 8, 256>}]} {
    %c0 = arith.constant 0 : index
    %c0_0 = arith.constant 0 : index
    %c0_1 = arith.constant 0 : index
    %0 = vector.load %arg3[%c0, %c0_0, %c0_1] : memref<1x8x256xf32, #tpu.memory_space<vmem>>, vector<1x8x256xf32>
    %1 = vector.shape_cast %0 : vector<1x8x256xf32> to vector<8x256xf32>
    %c0_2 = arith.constant 0 : index
    %c0_3 = arith.constant 0 : index
    %2 = vector.load %arg6[%c0_2, %c0_3] : memref<8x8xf32, #tpu.memory_space<vmem>>, vector<8x8xf32>
    %cst = arith.constant dense<0.000000e+00> : vector<8x256xf32>
    %3 = tpu.matmul %2, %1, %cst {dimension_numbers = #tpu.dot_dimension_numbers<[1], [0], [0], [1], [0, 0, 1, 1], [], []>} : vector<8x8xf32>, vector<8x256xf32>, vector<8x256xf32> -> vector<8x256xf32>
    %c0_4 = arith.constant 0 : index
    %c0_5 = arith.constant 0 : index
    %4 = vector.load %arg7[%c0_4, %c0_5] : memref<8x1xf32, #tpu.memory_space<vmem>>, vector<8x1xf32>
    %5 = vector.broadcast %4 : vector<8x1xf32> to vector<8x256xf32>
    %6 = arith.addf %3, %5 : vector<8x256xf32>
    %cst_6 = arith.constant 0.000000e+00 : f32
    %7 = vector.broadcast %cst_6 : f32 to vector<8x256xf32>
    %8 = arith.maximumf %6, %7 : vector<8x256xf32>
    %c0_7 = arith.constant 0 : index
    %c0_8 = arith.constant 0 : index
    %c0_9 = arith.constant 0 : index
    %9 = vector.load %arg2[%c0_7, %c0_8, %c0_9] : memref<1x256x64xf32, #tpu.memory_space<vmem>>, vector<1x256x64xf32>
    %10 = vector.shape_cast %9 : vector<1x256x64xf32> to vector<256x64xf32>
    %cst_10 = arith.constant dense<0.000000e+00> : vector<8x64xf32>
    %11 = tpu.matmul %8, %10, %cst_10 {dimension_numbers = #tpu.dot_dimension_numbers<[1], [0], [0], [1], [0, 0, 1, 1], [], []>} : vector<8x256xf32>, vector<256x64xf32>, vector<8x64xf32> -> vector<8x64xf32>
    %c0_11 = arith.constant 0 : index
    %c0_12 = arith.constant 0 : index
    %c0_13 = arith.constant 0 : index
    %12 = vector.load %arg5[%c0_11, %c0_12, %c0_13] : memref<1x1x64xf32, #tpu.memory_space<vmem>>, vector<1x1x64xf32>
    %13 = vector.shape_cast %12 : vector<1x1x64xf32> to vector<1x64xf32>
    %14 = arith.negf %13 : vector<1x64xf32>
    %15 = math.exp %14 : vector<1x64xf32>
    %cst_14 = arith.constant 1.000000e+00 : f32
    %16 = vector.broadcast %cst_14 : f32 to vector<1x64xf32>
    %17 = arith.addf %16, %15 : vector<1x64xf32>
    %18 = arith.divf %16, %17 : vector<1x64xf32>
    %c0_15 = arith.constant 0 : index
    %c0_16 = arith.constant 0 : index
    %c0_17 = arith.constant 0 : index
    %19 = vector.load %arg4[%c0_15, %c0_16, %c0_17] : memref<1x8x64xf32, #tpu.memory_space<vmem>>, vector<1x8x64xf32>
    %20 = vector.shape_cast %19 : vector<1x8x64xf32> to vector<8x64xf32>
    %21 = tpu.concatenate %20, %11 in 0 : vector<8x64xf32>, vector<8x64xf32> -> vector<16x64xf32>
    %c0_18 = arith.constant 0 : index
    %c0_19 = arith.constant 0 : index
    %22 = vector.load %arg8[%c0_18, %c0_19] : memref<8x16xf32, #tpu.memory_space<vmem>>, vector<8x16xf32>
    %cst_20 = arith.constant dense<0.000000e+00> : vector<8x64xf32>
    %23 = tpu.matmul %22, %21, %cst_20 {dimension_numbers = #tpu.dot_dimension_numbers<[1], [0], [0], [1], [0, 0, 1, 1], [], []>} : vector<8x16xf32>, vector<16x64xf32>, vector<8x64xf32> -> vector<8x64xf32>
    %c0_21 = arith.constant 0 : index
    %c0_22 = arith.constant 0 : index
    %24 = vector.load %arg9[%c0_21, %c0_22] : memref<8x1xf32, #tpu.memory_space<vmem>>, vector<8x1xf32>
    %25 = vector.broadcast %24 : vector<8x1xf32> to vector<8x64xf32>
    %26 = vector.broadcast %18 : vector<1x64xf32> to vector<8x64xf32>
    %27 = arith.mulf %25, %26 : vector<8x64xf32>
    %28 = arith.addf %23, %27 : vector<8x64xf32>
    %c0_23 = arith.constant 0 : index
    %c0_24 = arith.constant 0 : index
    %29 = vector.load %arg10[%c0_23, %c0_24] : memref<8x1xf32, #tpu.memory_space<vmem>>, vector<8x1xf32>
    %30 = vector.broadcast %29 : vector<8x1xf32> to vector<8x64xf32>
    %31 = arith.addf %28, %30 : vector<8x64xf32>
    %cst_25 = arith.constant 0.000000e+00 : f32
    %32 = vector.broadcast %cst_25 : f32 to vector<8x64xf32>
    %33 = arith.maximumf %31, %32 : vector<8x64xf32>
    %c0_26 = arith.constant 0 : index
    %c0_27 = arith.constant 0 : index
    %34 = vector.load %arg11[%c0_26, %c0_27] : memref<216x8xf32, #tpu.memory_space<vmem>>, vector<216x8xf32>
    %cst_28 = arith.constant dense<0.000000e+00> : vector<216x64xf32>
    %35 = tpu.matmul %34, %33, %cst_28 {dimension_numbers = #tpu.dot_dimension_numbers<[1], [0], [0], [1], [0, 0, 1, 1], [], []>} : vector<216x8xf32>, vector<8x64xf32>, vector<216x64xf32> -> vector<216x64xf32>
    %cst_29 = arith.constant 0.000000e+00 : f32
    %36 = vector.broadcast %cst_29 : f32 to vector<8x64xf32>
    %37 = vector.extract_strided_slice %35 {offsets = [0, 0], sizes = [72, 64], strides = [1, 1]} : vector<216x64xf32> to vector<72x64xf32>
    %38 = vector.extract_strided_slice %37 {offsets = [0, 0], sizes = [8, 64], strides = [1, 1]} : vector<72x64xf32> to vector<8x64xf32>
    %39 = vector.extract_strided_slice %37 {offsets = [8, 0], sizes = [8, 64], strides = [1, 1]} : vector<72x64xf32> to vector<8x64xf32>
    %40 = vector.extract_strided_slice %37 {offsets = [16, 0], sizes = [8, 64], strides = [1, 1]} : vector<72x64xf32> to vector<8x64xf32>
    %41 = vector.extract_strided_slice %37 {offsets = [24, 0], sizes = [8, 64], strides = [1, 1]} : vector<72x64xf32> to vector<8x64xf32>
    %42 = vector.extract_strided_slice %37 {offsets = [32, 0], sizes = [8, 64], strides = [1, 1]} : vector<72x64xf32> to vector<8x64xf32>
    %43 = vector.extract_strided_slice %37 {offsets = [40, 0], sizes = [8, 64], strides = [1, 1]} : vector<72x64xf32> to vector<8x64xf32>
    %44 = vector.extract_strided_slice %37 {offsets = [48, 0], sizes = [8, 64], strides = [1, 1]} : vector<72x64xf32> to vector<8x64xf32>
    %45 = vector.extract_strided_slice %37 {offsets = [56, 0], sizes = [8, 64], strides = [1, 1]} : vector<72x64xf32> to vector<8x64xf32>
    %46 = vector.extract_strided_slice %37 {offsets = [64, 0], sizes = [8, 64], strides = [1, 1]} : vector<72x64xf32> to vector<8x64xf32>
    %47 = tpu.concatenate %38, %39, %40, %41, %42, %43, %44, %45, %46 in 1 : vector<8x64xf32>, vector<8x64xf32>, vector<8x64xf32>, vector<8x64xf32>, vector<8x64xf32>, vector<8x64xf32>, vector<8x64xf32>, vector<8x64xf32>, vector<8x64xf32> -> vector<8x576xf32>
    %c0_30 = arith.constant 0 : index
    %c0_31 = arith.constant 0 : index
    %c0_32 = arith.constant 0 : index
    %48 = vector.load %arg13[%c0_30, %c0_31, %c0_32] : memref<3x576x64xf32, #tpu.memory_space<vmem>>, vector<1x576x64xf32>
    %49 = vector.shape_cast %48 : vector<1x576x64xf32> to vector<576x64xf32>
    %cst_33 = arith.constant dense<0.000000e+00> : vector<8x64xf32>
    %50 = tpu.matmul %47, %49, %cst_33 {dimension_numbers = #tpu.dot_dimension_numbers<[1], [0], [0], [1], [0, 0, 1, 1], [], []>} : vector<8x576xf32>, vector<576x64xf32>, vector<8x64xf32> -> vector<8x64xf32>
    %c0_34 = arith.constant 0 : index
    %c0_35 = arith.constant 0 : index
    %c0_36 = arith.constant 0 : index
    %51 = vector.load %arg12[%c0_34, %c0_35, %c0_36] : memref<3x8x1xf32, #tpu.memory_space<vmem>>, vector<1x8x1xf32>
    %52 = vector.shape_cast %51 : vector<1x8x1xf32> to vector<8x1xf32>
    %53 = vector.broadcast %52 : vector<8x1xf32> to vector<8x64xf32>
    %54 = arith.addf %50, %53 : vector<8x64xf32>
    %cst_37 = arith.constant 0.000000e+00 : f32
    %55 = vector.broadcast %cst_37 : f32 to vector<8x64xf32>
    %56 = arith.maximumf %54, %55 : vector<8x64xf32>
    %57 = arith.addf %36, %56 : vector<8x64xf32>
    %58 = vector.extract_strided_slice %35 {offsets = [72, 0], sizes = [72, 64], strides = [1, 1]} : vector<216x64xf32> to vector<72x64xf32>
    %59 = vector.extract_strided_slice %58 {offsets = [0, 0], sizes = [8, 64], strides = [1, 1]} : vector<72x64xf32> to vector<8x64xf32>
    %60 = vector.extract_strided_slice %58 {offsets = [8, 0], sizes = [8, 64], strides = [1, 1]} : vector<72x64xf32> to vector<8x64xf32>
    %61 = vector.extract_strided_slice %58 {offsets = [16, 0], sizes = [8, 64], strides = [1, 1]} : vector<72x64xf32> to vector<8x64xf32>
    %62 = vector.extract_strided_slice %58 {offsets = [24, 0], sizes = [8, 64], strides = [1, 1]} : vector<72x64xf32> to vector<8x64xf32>
    %63 = vector.extract_strided_slice %58 {offsets = [32, 0], sizes = [8, 64], strides = [1, 1]} : vector<72x64xf32> to vector<8x64xf32>
    %64 = vector.extract_strided_slice %58 {offsets = [40, 0], sizes = [8, 64], strides = [1, 1]} : vector<72x64xf32> to vector<8x64xf32>
    %65 = vector.extract_strided_slice %58 {offsets = [48, 0], sizes = [8, 64], strides = [1, 1]} : vector<72x64xf32> to vector<8x64xf32>
    %66 = vector.extract_strided_slice %58 {offsets = [56, 0], sizes = [8, 64], strides = [1, 1]} : vector<72x64xf32> to vector<8x64xf32>
    %67 = vector.extract_strided_slice %58 {offsets = [64, 0], sizes = [8, 64], strides = [1, 1]} : vector<72x64xf32> to vector<8x64xf32>
    %68 = tpu.concatenate %59, %60, %61, %62, %63, %64, %65, %66, %67 in 1 : vector<8x64xf32>, vector<8x64xf32>, vector<8x64xf32>, vector<8x64xf32>, vector<8x64xf32>, vector<8x64xf32>, vector<8x64xf32>, vector<8x64xf32>, vector<8x64xf32> -> vector<8x576xf32>
    %c1 = arith.constant 1 : index
    %c0_38 = arith.constant 0 : index
    %c0_39 = arith.constant 0 : index
    %69 = vector.load %arg13[%c1, %c0_38, %c0_39] : memref<3x576x64xf32, #tpu.memory_space<vmem>>, vector<1x576x64xf32>
    %70 = vector.shape_cast %69 : vector<1x576x64xf32> to vector<576x64xf32>
    %cst_40 = arith.constant dense<0.000000e+00> : vector<8x64xf32>
    %71 = tpu.matmul %68, %70, %cst_40 {dimension_numbers = #tpu.dot_dimension_numbers<[1], [0], [0], [1], [0, 0, 1, 1], [], []>} : vector<8x576xf32>, vector<576x64xf32>, vector<8x64xf32> -> vector<8x64xf32>
    %c1_41 = arith.constant 1 : index
    %c0_42 = arith.constant 0 : index
    %c0_43 = arith.constant 0 : index
    %72 = vector.load %arg12[%c1_41, %c0_42, %c0_43] : memref<3x8x1xf32, #tpu.memory_space<vmem>>, vector<1x8x1xf32>
    %73 = vector.shape_cast %72 : vector<1x8x1xf32> to vector<8x1xf32>
    %74 = vector.broadcast %73 : vector<8x1xf32> to vector<8x64xf32>
    %75 = arith.addf %71, %74 : vector<8x64xf32>
    %cst_44 = arith.constant 0.000000e+00 : f32
    %76 = vector.broadcast %cst_44 : f32 to vector<8x64xf32>
    %77 = arith.maximumf %75, %76 : vector<8x64xf32>
    %78 = arith.addf %57, %77 : vector<8x64xf32>
    %79 = vector.extract_strided_slice %35 {offsets = [144, 0], sizes = [72, 64], strides = [1, 1]} : vector<216x64xf32> to vector<72x64xf32>
    %80 = vector.extract_strided_slice %79 {offsets = [0, 0], sizes = [8, 64], strides = [1, 1]} : vector<72x64xf32> to vector<8x64xf32>
    %81 = vector.extract_strided_slice %79 {offsets = [8, 0], sizes = [8, 64], strides = [1, 1]} : vector<72x64xf32> to vector<8x64xf32>
    %82 = vector.extract_strided_slice %79 {offsets = [16, 0], sizes = [8, 64], strides = [1, 1]} : vector<72x64xf32> to vector<8x64xf32>
    %83 = vector.extract_strided_slice %79 {offsets = [24, 0], sizes = [8, 64], strides = [1, 1]} : vector<72x64xf32> to vector<8x64xf32>
    %84 = vector.extract_strided_slice %79 {offsets = [32, 0], sizes = [8, 64], strides = [1, 1]} : vector<72x64xf32> to vector<8x64xf32>
    %85 = vector.extract_strided_slice %79 {offsets = [40, 0], sizes = [8, 64], strides = [1, 1]} : vector<72x64xf32> to vector<8x64xf32>
    %86 = vector.extract_strided_slice %79 {offsets = [48, 0], sizes = [8, 64], strides = [1, 1]} : vector<72x64xf32> to vector<8x64xf32>
    %87 = vector.extract_strided_slice %79 {offsets = [56, 0], sizes = [8, 64], strides = [1, 1]} : vector<72x64xf32> to vector<8x64xf32>
    %88 = vector.extract_strided_slice %79 {offsets = [64, 0], sizes = [8, 64], strides = [1, 1]} : vector<72x64xf32> to vector<8x64xf32>
    %89 = tpu.concatenate %80, %81, %82, %83, %84, %85, %86, %87, %88 in 1 : vector<8x64xf32>, vector<8x64xf32>, vector<8x64xf32>, vector<8x64xf32>, vector<8x64xf32>, vector<8x64xf32>, vector<8x64xf32>, vector<8x64xf32>, vector<8x64xf32> -> vector<8x576xf32>
    %c2 = arith.constant 2 : index
    %c0_45 = arith.constant 0 : index
    %c0_46 = arith.constant 0 : index
    %90 = vector.load %arg13[%c2, %c0_45, %c0_46] : memref<3x576x64xf32, #tpu.memory_space<vmem>>, vector<1x576x64xf32>
    %91 = vector.shape_cast %90 : vector<1x576x64xf32> to vector<576x64xf32>
    %cst_47 = arith.constant dense<0.000000e+00> : vector<8x64xf32>
    %92 = tpu.matmul %89, %91, %cst_47 {dimension_numbers = #tpu.dot_dimension_numbers<[1], [0], [0], [1], [0, 0, 1, 1], [], []>} : vector<8x576xf32>, vector<576x64xf32>, vector<8x64xf32> -> vector<8x64xf32>
    %c2_48 = arith.constant 2 : index
    %c0_49 = arith.constant 0 : index
    %c0_50 = arith.constant 0 : index
    %93 = vector.load %arg12[%c2_48, %c0_49, %c0_50] : memref<3x8x1xf32, #tpu.memory_space<vmem>>, vector<1x8x1xf32>
    %94 = vector.shape_cast %93 : vector<1x8x1xf32> to vector<8x1xf32>
    %95 = vector.broadcast %94 : vector<8x1xf32> to vector<8x64xf32>
    %96 = arith.addf %92, %95 : vector<8x64xf32>
    %cst_51 = arith.constant 0.000000e+00 : f32
    %97 = vector.broadcast %cst_51 : f32 to vector<8x64xf32>
    %98 = arith.maximumf %96, %97 : vector<8x64xf32>
    %99 = arith.addf %78, %98 : vector<8x64xf32>
    %c0_52 = arith.constant 0 : index
    %c0_53 = arith.constant 0 : index
    %100 = vector.load %arg14[%c0_52, %c0_53] : memref<8x8xf32, #tpu.memory_space<vmem>>, vector<8x8xf32>
    %cst_54 = arith.constant dense<0.000000e+00> : vector<8x64xf32>
    %101 = tpu.matmul %100, %99, %cst_54 {dimension_numbers = #tpu.dot_dimension_numbers<[1], [0], [0], [1], [0, 0, 1, 1], [], []>} : vector<8x8xf32>, vector<8x64xf32>, vector<8x64xf32> -> vector<8x64xf32>
    %c0_55 = arith.constant 0 : index
    %c0_56 = arith.constant 0 : index
    %102 = vector.load %arg15[%c0_55, %c0_56] : memref<8x1xf32, #tpu.memory_space<vmem>>, vector<8x1xf32>
    %103 = vector.broadcast %102 : vector<8x1xf32> to vector<8x64xf32>
    %104 = arith.addf %101, %103 : vector<8x64xf32>
    %cst_57 = arith.constant 0.000000e+00 : f32
    %105 = vector.broadcast %cst_57 : f32 to vector<8x64xf32>
    %106 = arith.maximumf %104, %105 : vector<8x64xf32>
    %c0_58 = arith.constant 0 : index
    %c0_59 = arith.constant 0 : index
    %107 = vector.load %arg16[%c0_58, %c0_59] : memref<7x8xf32, #tpu.memory_space<vmem>>, vector<7x8xf32>
    %cst_60 = arith.constant dense<0.000000e+00> : vector<7x64xf32>
    %108 = tpu.matmul %107, %106, %cst_60 {dimension_numbers = #tpu.dot_dimension_numbers<[1], [0], [0], [1], [0, 0, 1, 1], [], []>} : vector<7x8xf32>, vector<8x64xf32>, vector<7x64xf32> -> vector<7x64xf32>
    %c0_61 = arith.constant 0 : index
    %c0_62 = arith.constant 0 : index
    %109 = vector.load %arg17[%c0_61, %c0_62] : memref<7x1xf32, #tpu.memory_space<vmem>>, vector<7x1xf32>
    %110 = vector.broadcast %109 : vector<7x1xf32> to vector<7x64xf32>
    %111 = arith.addf %108, %110 : vector<7x64xf32>
    %cst_63 = arith.constant 0.000000e+00 : f32
    %112 = vector.broadcast %cst_63 : f32 to vector<7x64xf32>
    %113 = arith.maximumf %111, %112 : vector<7x64xf32>
    %c0_64 = arith.constant 0 : index
    %c0_65 = arith.constant 0 : index
    %114 = vector.load %arg18[%c0_64, %c0_65] : memref<64x256xf32, #tpu.memory_space<vmem>>, vector<64x256xf32>
    %cst_66 = arith.constant dense<0.000000e+00> : vector<7x256xf32>
    %115 = tpu.matmul %113, %114, %cst_66 {dimension_numbers = #tpu.dot_dimension_numbers<[1], [0], [0], [1], [0, 0, 1, 1], [], []>} : vector<7x64xf32>, vector<64x256xf32>, vector<7x256xf32> -> vector<7x256xf32>
    %c0_67 = arith.constant 0 : index
    %c0_68 = arith.constant 0 : index
    %116 = vector.load %arg18[%c0_67, %c0_68] : memref<64x256xf32, #tpu.memory_space<vmem>>, vector<64x256xf32>
    %cst_69 = arith.constant dense<0.000000e+00> : vector<1x256xf32>
    %117 = tpu.matmul %18, %116, %cst_69 {dimension_numbers = #tpu.dot_dimension_numbers<[1], [0], [0], [1], [0, 0, 1, 1], [], []>} : vector<1x64xf32>, vector<64x256xf32>, vector<1x256xf32> -> vector<1x256xf32>
    %c0_70 = arith.constant 0 : index
    %c0_71 = arith.constant 0 : index
    %c0_72 = arith.constant 0 : index
    %118 = vector.load %arg19[%c0_70, %c0_71, %c0_72] : memref<1x8x256xf32, #tpu.memory_space<vmem>>, vector<1x7x256xf32>
    %119 = vector.shape_cast %118 : vector<1x7x256xf32> to vector<7x256xf32>
    %120 = vector.shape_cast %115 : vector<7x256xf32> to vector<1x7x256xf32>
    tpu.vector_store %arg19[%c0_70, %c0_71, %c0_72], %120 {strides = array<i32>} : memref<1x8x256xf32, #tpu.memory_space<vmem>>, vector<1x7x256xf32>,
    %c0_73 = arith.constant 0 : index
    %c7 = arith.constant 7 : index
    %c0_74 = arith.constant 0 : index
    %121 = vector.load %arg19[%c0_73, %c7, %c0_74] : memref<1x8x256xf32, #tpu.memory_space<vmem>>, vector<1x1x256xf32>
    %122 = vector.shape_cast %121 : vector<1x1x256xf32> to vector<1x256xf32>
    %123 = vector.shape_cast %117 : vector<1x256xf32> to vector<1x1x256xf32>
    tpu.vector_store %arg19[%c0_73, %c7, %c0_74], %123 {strides = array<i32>} : memref<1x8x256xf32, #tpu.memory_space<vmem>>, vector<1x1x256xf32>,
    return
  }
  func.func @transform_0(%arg0: i32, %arg1: memref<4xi32, #tpu.memory_space<smem>>) -> (i32, i32, i32) {
    %c0_i32 = arith.constant 0 : i32
    %c0_i32_0 = arith.constant 0 : i32
    %c0_i32_1 = arith.constant 0 : i32
    return %arg0, %c0_i32, %c0_i32_0 : i32, i32, i32
  }
  func.func @transform_1(%arg0: i32, %arg1: memref<4xi32, #tpu.memory_space<smem>>) -> (i32, i32, i32) {
    %0 = arith.index_cast %arg0 : i32 to index
    %1 = memref.load %arg1[%0] : memref<4xi32, #tpu.memory_space<smem>>
    %c0_i32 = arith.constant 0 : i32
    %c0_i32_0 = arith.constant 0 : i32
    %c0_i32_1 = arith.constant 0 : i32
    return %1, %c0_i32, %c0_i32_0 : i32, i32, i32
  }
  func.func @transform_2(%arg0: i32, %arg1: memref<4xi32, #tpu.memory_space<smem>>) -> (i32, i32, i32) {
    %c0_i32 = arith.constant 0 : i32
    %c0_i32_0 = arith.constant 0 : i32
    %c0_i32_1 = arith.constant 0 : i32
    return %arg0, %c0_i32, %c0_i32_0 : i32, i32, i32
  }
  func.func @transform_3(%arg0: i32, %arg1: memref<4xi32, #tpu.memory_space<smem>>) -> (i32, i32, i32) {
    %c0_i32 = arith.constant 0 : i32
    %c0_i32_0 = arith.constant 0 : i32
    %c0_i32_1 = arith.constant 0 : i32
    return %arg0, %c0_i32, %c0_i32_0 : i32, i32, i32
  }
  func.func @transform_4(%arg0: i32, %arg1: memref<4xi32, #tpu.memory_space<smem>>) -> (i32, i32) {
    %c0_i32 = arith.constant 0 : i32
    %c0_i32_0 = arith.constant 0 : i32
    %c0_i32_1 = arith.constant 0 : i32
    return %c0_i32, %c0_i32_0 : i32, i32
  }
  func.func @transform_5(%arg0: i32, %arg1: memref<4xi32, #tpu.memory_space<smem>>) -> (i32, i32) {
    %c0_i32 = arith.constant 0 : i32
    %c0_i32_0 = arith.constant 0 : i32
    %c0_i32_1 = arith.constant 0 : i32
    return %c0_i32, %c0_i32_0 : i32, i32
  }
  func.func @transform_6(%arg0: i32, %arg1: memref<4xi32, #tpu.memory_space<smem>>) -> (i32, i32) {
    %c0_i32 = arith.constant 0 : i32
    %c0_i32_0 = arith.constant 0 : i32
    %c0_i32_1 = arith.constant 0 : i32
    return %c0_i32, %c0_i32_0 : i32, i32
  }
  func.func @transform_7(%arg0: i32, %arg1: memref<4xi32, #tpu.memory_space<smem>>) -> (i32, i32) {
    %c0_i32 = arith.constant 0 : i32
    %c0_i32_0 = arith.constant 0 : i32
    %c0_i32_1 = arith.constant 0 : i32
    return %c0_i32, %c0_i32_0 : i32, i32
  }
  func.func @transform_8(%arg0: i32, %arg1: memref<4xi32, #tpu.memory_space<smem>>) -> (i32, i32) {
    %c0_i32 = arith.constant 0 : i32
    %c0_i32_0 = arith.constant 0 : i32
    %c0_i32_1 = arith.constant 0 : i32
    return %c0_i32, %c0_i32_0 : i32, i32
  }
  func.func @transform_9(%arg0: i32, %arg1: memref<4xi32, #tpu.memory_space<smem>>) -> (i32, i32) {
    %c0_i32 = arith.constant 0 : i32
    %c0_i32_0 = arith.constant 0 : i32
    %c0_i32_1 = arith.constant 0 : i32
    return %c0_i32, %c0_i32_0 : i32, i32
  }
  func.func @transform_10(%arg0: i32, %arg1: memref<4xi32, #tpu.memory_space<smem>>) -> (i32, i32, i32) {
    %c0_i32 = arith.constant 0 : i32
    %c0_i32_0 = arith.constant 0 : i32
    %c0_i32_1 = arith.constant 0 : i32
    %c0_i32_2 = arith.constant 0 : i32
    return %c0_i32, %c0_i32_0, %c0_i32_1 : i32, i32, i32
  }
  func.func @transform_11(%arg0: i32, %arg1: memref<4xi32, #tpu.memory_space<smem>>) -> (i32, i32, i32) {
    %c0_i32 = arith.constant 0 : i32
    %c0_i32_0 = arith.constant 0 : i32
    %c0_i32_1 = arith.constant 0 : i32
    %c0_i32_2 = arith.constant 0 : i32
    return %c0_i32, %c0_i32_0, %c0_i32_1 : i32, i32, i32
  }
  func.func @transform_12(%arg0: i32, %arg1: memref<4xi32, #tpu.memory_space<smem>>) -> (i32, i32) {
    %c0_i32 = arith.constant 0 : i32
    %c0_i32_0 = arith.constant 0 : i32
    %c0_i32_1 = arith.constant 0 : i32
    return %c0_i32, %c0_i32_0 : i32, i32
  }
  func.func @transform_13(%arg0: i32, %arg1: memref<4xi32, #tpu.memory_space<smem>>) -> (i32, i32) {
    %c0_i32 = arith.constant 0 : i32
    %c0_i32_0 = arith.constant 0 : i32
    %c0_i32_1 = arith.constant 0 : i32
    return %c0_i32, %c0_i32_0 : i32, i32
  }
  func.func @transform_14(%arg0: i32, %arg1: memref<4xi32, #tpu.memory_space<smem>>) -> (i32, i32) {
    %c0_i32 = arith.constant 0 : i32
    %c0_i32_0 = arith.constant 0 : i32
    %c0_i32_1 = arith.constant 0 : i32
    return %c0_i32, %c0_i32_0 : i32, i32
  }
  func.func @transform_15(%arg0: i32, %arg1: memref<4xi32, #tpu.memory_space<smem>>) -> (i32, i32) {
    %c0_i32 = arith.constant 0 : i32
    %c0_i32_0 = arith.constant 0 : i32
    %c0_i32_1 = arith.constant 0 : i32
    return %c0_i32, %c0_i32_0 : i32, i32
  }
  func.func @transform_16(%arg0: i32, %arg1: memref<4xi32, #tpu.memory_space<smem>>) -> (i32, i32) {
    %c0_i32 = arith.constant 0 : i32
    %c0_i32_0 = arith.constant 0 : i32
    %c0_i32_1 = arith.constant 0 : i32
    return %c0_i32, %c0_i32_0 : i32, i32
  }
  func.func @transform_17(%arg0: i32, %arg1: memref<4xi32, #tpu.memory_space<smem>>) -> (i32, i32, i32) {
    %c0_i32 = arith.constant 0 : i32
    %c0_i32_0 = arith.constant 0 : i32
    %c0_i32_1 = arith.constant 0 : i32
    return %arg0, %c0_i32, %c0_i32_0 : i32, i32, i32
  }
}

</mosaic_0001>

<bundles_post_ra>
// kernel: sfm_forward.1
= control target key start
LH: loop header
LB: loop body
LE: loop exit
PB: predicated region body
PF: predicated region fallthrough
CT: control target
= control target key end

     0   :  { %s4820_s0 = inlined_call_operand.vmem [shape: s32[4], index: 0, kind: input, shape index: {}]   ;;  %s4821_s1 = inlined_call_operand.vmem [shape: f32[4,256,64], index: 1, kind: input, shape index: {}]   ;;  %s4822_s2 = inlined_call_operand.vmem [shape: f32[2,8,256], index: 2, kind: input, shape index: {}]   ;;  %s4823_s3 = inlined_call_operand.vmem [shape: f32[4,8,64], index: 3, kind: input, shape index: {}]   ;;  %s4824_s4 = inlined_call_operand.vmem [shape: f32[4,1,64], index: 4, kind: input, shape index: {}]   ;;  %s4825_s5 = inlined_call_operand.vmem [shape: f32[8,8], index: 5, kind: input, shape index: {}]   ;;  %s4826_s6 = inlined_call_operand.vmem [shape: f32[8,1], index: 6, kind: input, shape index: {}]   ;;  %s4827_s7 = inlined_call_operand.vmem [shape: f32[8,16], index: 7, kind: input, shape index: {}]   ;;  %s4828_s8 = inlined_call_operand.vmem [shape: f32[8,1], index: 8, kind: input, shape index: {}]   ;;  %s4829_s9 = inlined_call_operand.vmem [shape: f32[8,1], index: 9, kind: input, shape index: {}]   ;;  %s4830_s10 = inlined_call_operand.vmem [shape: f32[216,8], index: 10, kind: input, shape index: {}]   ;;  %s4831_s11 = inlined_call_operand.vmem [shape: f32[3,8,1], index: 11, kind: input, shape index: {}]   ;;  %s4832_s12 = inlined_call_operand.vmem [shape: f32[3,576,64], index: 12, kind: input, shape index: {}]   ;;  %s4833_s13 = inlined_call_operand.vmem [shape: f32[8,8], index: 13, kind: input, shape index: {}]   ;;  %s4834_s14 = inlined_call_operand.vmem [shape: f32[8,1], index: 14, kind: input, shape index: {}]   ;;  %s4835_s15 = inlined_call_operand.vmem [shape: f32[7,8], index: 15, kind: input, shape index: {}]   ;;  %s4836_s16 = inlined_call_operand.vmem [shape: f32[7,1], index: 16, kind: input, shape index: {}]   ;;  %s4837_s17 = inlined_call_operand.vmem [shape: f32[64,256], index: 17, kind: input, shape index: {}]   ;;  %s4838_s18 = inlined_call_operand.vmem [shape: f32[4,8,256], index: 18, kind: output, shape index: {}]  }
   0x1   :  { %4840 = sst [smem:[#allocation5_spill]] %s4820_s0 }
   0x2   :  { %4841 = sst [smem:[#allocation6_spill]] %s4821_s1  ;;  %s4844_s29 = sld [smem:[#allocation5_spill]] }
   0x3   :  { %4842 = sst [smem:[#allocation7_spill]] %s4822_s2 }
   0x4   :  { %4843 = sst [smem:[#allocation8_spill]] %s4831_s11 }
   0x8   :  { %s23_s11 = sshll.u32 %s4844_s29, 4  ;;  %s24_s11 = int_to_ptr.vmem [resolvable:$true] %s23_s11 }
   0x9   :  { %s3609_s30 = scalar_lea.vmem %s24_s11, 16  ;;  %p3614_p1 = scmp.lt.s32.totalorder %s24_s11, %s24_s11 }
   0xa   :  { %p3610_p0 = scmp.ne.s32.totalorder %s24_s11, %s3609_s30  ;;  %p3615_p2 = scmp.lt.s32.totalorder %s3609_s30, %s3609_s30 }
   0xc   :  { %p3616_p3 = por %p3615_p2, %p3614_p1 }
   0xe   :  { %p3617_p4 = pnand %p3616_p3, %p3610_p0 }
  0x10   :  { %3620 = shalt.err (!%p3617_p4)  }
  0x11   :  { %s3631_s0 = smov [#allocation3]  }
  0x12   :  { %26 = dma.vmem_to_smem %s24_s11, 16, %s3631_s0, [#allocation2] }
  0x13   :  { %3625 = dma.done.wait [#allocation2], 16 }
  0x14   :  { %3626 = vsyncadd [#allocation2], 4294967280 }
  0x15   :  { %28 = sfence }
  0x16   :  { %s3736_s19 = smov 0  }
  0x17 LB: > { %s2598_s1 = sadd.s32 4294967295, %s3629_s19   ;;  %p2602_p5 = scmp.ge.s32.totalorder %s3629_s19, 1  ;;  %s3629_s19 = sphi %s3736_s19, %s34_s19  }
  0x18   : > { %p525_p6 = scmp.lt.s32.totalorder %s3629_s19, 5 }
  0x1a   : > { %p526_p7 = pnand %p2602_p5, %p525_p6 }
  0x1b   : > { %s595_s20 = sld [smem:[#allocation3 + %s2598_s1]] (!%p526_p7)  ;;  %v617_v0 = vld [vmem:[%s4826_s6] sm:$0xff] (!%p526_p7)  ;;  %v3632_v1 = vmov (!%p526_p7), 0.0   ;;  %v3633_v2 = vmov (!%p526_p7), 0   ;;  %p590_p8 = scmp.lt.s32.totalorder (!%p526_p7), %s2598_s1, 3  ;;  %vm623_vm0 = vcmask (!%p526_p7), 64512  }
  0x1c   : > { %529 = sbr.rel (%p526_p7) target bundleno = 2030 (0x7ee), region = 88  ;;  %691 = vmatprep.mubr.f32.mxu0 (!%p526_p7), %v3632_v1  ;;  %3573 = vset.pattern.permute.xlu0 (!%p526_p7), %v3633_v2  ;;  %v811_v3 = vld [vmem:[%s4828_s8] sm:$0xff] (!%p526_p7)  ;;  %s4845_s26 = sld [smem:[#allocation6_spill]] (!%p526_p7)  ;;  %v3634_v62 = vmov (!%p526_p7), 0.0|0.0   ;;  %vm3635_vm1 = vmmov (!%p526_p7), 0   ;;  %vm824_vm2 = vcmask (!%p526_p7), 130048  }
  0x1d   : > { %620 = vperm.xlu0 (!%p526_p7), %3573, %v617_v0   ;;  %3574 = vset.pattern.permute.xlu1 (!%p526_p7), %v3633_v2  ;;  %s4846_s0 = sld [smem:[#allocation7_spill]] (!%p526_p7)  ;;  %v616_v17 = vld [vmem:[%s4825_s5] sm:$0xff] (!%p526_p7)  ;;  %vm1230_vm3 = vcmask (!%p526_p7), 523264  }
  0x1e   : > { %v898_v63 = vld [vmem:[%s4829_s9] sm:$0xff] (!%p526_p7) }
  0x1f   : > { %901 = vperm.xlu1 (!%p526_p7), %3574, %v898_v63  }
  0x21   : > { %p596_p9 = scmp.lt.s32.totalorder (!%p526_p7), %s595_s20, 1  ;;  %814 = vperm.xlu0 (!%p526_p7), %3573, %v811_v3  }
  0x23   : > { %s4849_s1 = smov (!%p590_p8, %s2598_s1), 3  ;;  %s4851_s20 = smov (!%p596_p9, %s595_s20), 1 }
  0x24   : > { %s2796_s23 = sshll.u32 %s4849_s1, 8  ;;  %s2797_s28 = sshll.u32 %s4851_s20, 4 }
  0x25   : > { %s3757_s27 = scalar_lea.vmem %s4845_s26, %s2796_s23  ;;  %s600_s11 = scalar_lea.vmem %s4846_s0, %s2797_s28 }
  0x26   : > { %v716_v4 = vld [vmem:[%s3757_s27 + $0x80] sm:$0xff]  ;;  %v717_v5 = vld [vmem:[%s3757_s27 + $0x88] sm:$0xff]  ;;  %v718_v9 = vld [vmem:[%s3757_s27 + $0x90] sm:$0xff]  ;;  %s2607_s23 = sshll.u32 %s4849_s1, 3  ;;  %s608_s0 = scalar_lea.vmem %s4824_s4, %s4849_s1 }
  0x27   : > { %v700_v6 = vld [vmem:[%s3757_s27] sm:$0xff]  ;;  %v3263_v7 = vpack.c.bf16 %v717_v5, %v716_v4  ;;  %v701_v8 = vld [vmem:[%s3757_s27 + $0x8] sm:$0xff]  ;;  %v719_v10 = vld [vmem:[%s3757_s27 + $0x98] sm:$0xff]  ;;  %s605_s26 = scalar_lea.vmem %s4823_s3, %s2607_s23  ;;  %s2798_s22 = sshll.u32 %s4849_s1, 4 }
  0x28   : > { %v3265_v11 = vpack.c.bf16 %v701_v8, %v700_v6  ;;  %v3267_v12 = vpack.c.bf16 %v719_v10, %v718_v9  ;;  %v702_v13 = vld [vmem:[%s3757_s27 + $0x10] sm:$0xff]  ;;  %v703_v14 = vld [vmem:[%s3757_s27 + $0x18] sm:$0xff]  ;;  %v720_v15 = vld [vmem:[%s3757_s27 + $0xa0] sm:$0xff]  ;;  %s613_s23 = scalar_lea.vmem %s4838_s18, %s2798_s22 }
  0x29   : > { %3264 = vmatprep.subr.bf16.mxu1 %v3263_v7  ;;  %v721_v16 = vld [vmem:[%s3757_s27 + $0xa8] sm:$0xff]  ;;  %v3269_v18 = vpack.c.bf16 %v703_v14, %v702_v13  ;;  %v704_v19 = vld [vmem:[%s3757_s27 + $0x20] sm:$0xff]  ;;  %v722_v24 = vld [vmem:[%s3757_s27 + $0xb0] sm:$0xff] }
  0x2a   : > { %3266 = vmatpush3.bf16.msra.mxu1 %v3265_v11  ;;  %v615_v20 = vld [vmem:[%s600_s11 + $0x8] sm:$0xff]  ;;  %v614_v21 = vld [vmem:[%s600_s11] sm:$0xff]  ;;  %v3271_v22 = vpack.c.bf16 %v721_v16, %v720_v15  ;;  %v723_v25 = vld [vmem:[%s3757_s27 + $0xb8] sm:$0xff]  ;;  %v818_v11 = vlaneseq }
  0x2b   : > { %3268 = vmatprep.subr.bf16.mxu1 %v3267_v12  ;;  %v705_v23 = vld [vmem:[%s3757_s27 + $0x28] sm:$0xff]  ;;  %627 = vmatprep.subr.mxu0 %v615_v20  ;;  %v3275_v27 = vpack.c.bf16 %v723_v25, %v722_v24  ;;  %v706_v28 = vld [vmem:[%s3757_s27 + $0x30] sm:$0xff]  ;;  %v707_v29 = vld [vmem:[%s3757_s27 + $0x38] sm:$0xff] }
  0x2c   : > { %628 = vmatpush1.msra.mxu0 %v614_v21  ;;  %v3273_v26 = vpack.c.bf16 %v705_v23, %v704_v19  ;;  %v724_v30 = vld [vmem:[%s3757_s27 + $0xc0] sm:$0xff]  ;;  %v725_v31 = vld [vmem:[%s3757_s27 + $0xc8] sm:$0xff]  ;;  %v3277_v32 = vpack.c.bf16 %v707_v29, %v706_v28  ;;  %v726_v36 = vld [vmem:[%s3757_s27 + $0xd0] sm:$0xff]  ;;  %v3819_v12 = vshrl.u32 %v818_v11, 7  ;;  %vm2505_vm4 = vcmp.lt.s32.totalorder %v818_v11, 256 }
  0x2d   : > { %2610 = vmatmul.mubr.msk.f32.vlgmr.msra.gmra.mrb[0].mxu0 %vm623_vm0, %v616_v17  ;;  %v3279_v33 = vpack.c.bf16 %v725_v31, %v724_v30  ;;  %v708_v34 = vld [vmem:[%s3757_s27 + $0x40] sm:$0xff]  ;;  %v709_v35 = vld [vmem:[%s3757_s27 + $0x48] sm:$0xff]  ;;  %v727_v37 = vld [vmem:[%s3757_s27 + $0xd8] sm:$0xff]  ;;  %3295 = vmatprep.subr.bf16.mxu0 %v3634_v62 }
  0x2e   : > { %3270 = vmatpush3.bf16.msra.mxu1 %v3269_v18  ;;  %v3281_v38 = vpack.c.bf16 %v709_v35, %v708_v34  ;;  %v3283_v39 = vpack.c.bf16 %v727_v37, %v726_v36  ;;  %v710_v40 = vld [vmem:[%s3757_s27 + $0x50] sm:$0xff]  ;;  %v711_v41 = vld [vmem:[%s3757_s27 + $0x58] sm:$0xff]  ;;  %v728_v42 = vld [vmem:[%s3757_s27 + $0xe0] sm:$0xff]  ;;  %3110 = vmatprep.mubr.msk.f32.mxu0 %vm3635_vm1, %v3632_v1  ;;  %v820_v13 = vsub.s32 0, %v3819_v12 }
  0x2f   : > { %3272 = vmatprep.subr.bf16.mxu1 %v3271_v22  ;;  %v729_v43 = vld [vmem:[%s3757_s27 + $0xe8] sm:$0xff]  ;;  %v3285_v44 = vpack.c.bf16 %v711_v41, %v710_v40  ;;  %v712_v46 = vld [vmem:[%s3757_s27 + $0x60] sm:$0xff]  ;;  %v730_v49 = vld [vmem:[%s3757_s27 + $0xf0] sm:$0xff] }
  0x30   : > { %v3287_v45 = vpack.c.bf16 %v729_v43, %v728_v42  ;;  %v713_v47 = vld [vmem:[%s3757_s27 + $0x68] sm:$0xff]  ;;  %v731_v50 = vld [vmem:[%s3757_s27 + $0xf8] sm:$0xff]  ;;  %v714_v52 = vld [vmem:[%s3757_s27 + $0x70] sm:$0xff] }
  0x31   : > { %v3289_v48 = vpack.c.bf16 %v713_v47, %v712_v46  ;;  %v3291_v51 = vpack.c.bf16 %v731_v50, %v730_v49  ;;  %v715_v53 = vld [vmem:[%s3757_s27 + $0x78] sm:$0xff]  ;;  %v809_v3 = vld [vmem:[%s605_s26] sm:$0xff]  ;;  %v907_v25 = vld [vmem:[%s4830_s10 + $0x8] sm:$0xff]  ;;  %s3636_s26 = smov 64   ;;  %s4847_s27 = sld [smem:[#allocation8_spill]] }
  0x32   : > { %3274 = vmatpush3.bf16.msra.mxu1 %v3273_v26  ;;  %v3293_v54 = vpack.c.bf16 %v715_v53, %v714_v52  ;;  %v810_v6 = vld [vmem:[%s4827_s7] sm:$0xff]  ;;  %v908_v26 = vld [vmem:[%s4830_s10 + $0x10] sm:$0xff]  ;;  %v911_v29 = vld [vmem:[%s4830_s10 + $0x28] sm:$0xff] }
  0x33   : > { %3276 = vmatprep.subr.bf16.mxu1 %v3275_v27  ;;  %v802_v7 = vld [vmem:[%s608_s0] sm:$0x1]  ;;  %v909_v27 = vld [vmem:[%s4830_s10 + $0x18] sm:$0xff]  ;;  %v912_v30 = vld [vmem:[%s4830_s10 + $0x30] sm:$0xff] }
  0x34   : > { %v2611_v8 = vmul.f32 -1.442695, %v802_v7  ;;  %v906_v24 = vld [vmem:[%s4830_s10] sm:$0xff]  ;;  %v913_v31 = vld [vmem:[%s4830_s10 + $0x38] sm:$0xff]  ;;  %v916_v34 = vld [vmem:[%s4830_s10 + $0x50] sm:$0xff] }
  0x35   : > { %v910_v28 = vld [vmem:[%s4830_s10 + $0x20] sm:$0xff]  ;;  %v917_v35 = vld [vmem:[%s4830_s10 + $0x58] sm:$0xff]  ;;  %v919_v37 = vld [vmem:[%s4830_s10 + $0x68] sm:$0xff] }
  0x36   : > { %3278 = vmatpush3.bf16.msra.mxu1 %v3277_v32  ;;  %3605 = vpow2.f32 %v2611_v8  ;;  %v914_v32 = vld [vmem:[%s4830_s10 + $0x40] sm:$0xff]  ;;  %v923_v41 = vld [vmem:[%s4830_s10 + $0x88] sm:$0xff]  ;;  %v924_v42 = vld [vmem:[%s4830_s10 + $0x90] sm:$0xff] }
  0x37   : > { %3280 = vmatprep.subr.bf16.mxu1 %v3279_v33  ;;  %v915_v33 = vld [vmem:[%s4830_s10 + $0x48] sm:$0xff]  ;;  %v918_v36 = vld [vmem:[%s4830_s10 + $0x60] sm:$0xff]  ;;  %v925_v43 = vld [vmem:[%s4830_s10 + $0x98] sm:$0xff] }
  0x38   : > { %v922_v40 = vld [vmem:[%s4830_s10 + $0x80] sm:$0xff]  ;;  %v928_v46 = vld [vmem:[%s4830_s10 + $0xb0] sm:$0xff]  ;;  %v929_v47 = vld [vmem:[%s4830_s10 + $0xb8] sm:$0xff] }
  0x39   : > { %v931_v49 = vld [vmem:[%s4830_s10 + $0xc8] sm:$0xff]  ;;  %v932_v50 = vld [vmem:[%s4830_s10 + $0xd0] sm:$0xff]  ;;  %v1254_v8 = vld [vmem:[%s4832_s12 + $0x98] sm:$0xff] }
  0x3a   : > { %3282 = vmatpush3.bf16.msra.mxu1 %v3281_v38  ;;  %v920_v38 = vld [vmem:[%s4830_s10 + $0x70] sm:$0xff]  ;;  %v2658_v52 = vld [vmem:[%s4832_s12 + $0x2c8] sm:$0xff] }
  0x3b   : > { %3284 = vmatprep.subr.bf16.mxu1 %v3283_v39  ;;  %v921_v39 = vld [vmem:[%s4830_s10 + $0x78] sm:$0xff]  ;;  %v1253_v7 = vld [vmem:[%s4832_s12 + $0x90] sm:$0xff] }
  0x3e   : > { %3286 = vmatpush3.bf16.msra.mxu1 %v3285_v44  ;;  %v926_v44 = vld [vmem:[%s4830_s10 + $0xa0] sm:$0xff] }
  0x3f   : > { %3288 = vmatprep.subr.bf16.mxu1 %v3287_v45  ;;  %v927_v45 = vld [vmem:[%s4830_s10 + $0xa8] sm:$0xff] }
  0x40   : > { %v3606_v9 = vpop.eup %3605 }
  0x41   : > { %v806_v10 = vadd.f32 1.0, %v3606_v9  ;;  %v3302_v9 = vpack.c.bf16 %v1254_v8, %v1253_v7 }
  0x42   : > { %3290 = vmatpush3.bf16.msra.mxu1 %v3289_v48  ;;  %v930_v48 = vld [vmem:[%s4830_s10 + $0xc0] sm:$0xff] }
  0x43   : > { %3292 = vmatprep.subr.bf16.mxu1 %v3291_v51  ;;  %3607 = vrcp.f32 %v806_v10  ;;  %v2657_v51 = vld [vmem:[%s4832_s12 + $0x2c0] sm:$0xff]  ;;  %v1237_v10 = vld [vmem:[%s4832_s12 + $0x10] sm:$0xff] }
  0x44   : > { %v3374_v53 = vpack.c.bf16 %v2658_v52, %v2657_v51  ;;  %v1263_v51 = vld [vmem:[%s4832_s12 + $0xe0] sm:$0xff]  ;;  %v1264_v52 = vld [vmem:[%s4832_s12 + $0xe8] sm:$0xff] }
  0x46   : > { %3294 = vmatpush3.bf16.msra.mxu1 %v3293_v54  ;;  %v2641_v54 = vld [vmem:[%s4832_s12 + $0x240] sm:$0xff] }
  0x4d   : > { %v3822_v14 = vpop.eup %3607 }
  0x4e   : > { %v821_v15 = vrot.slane %v3822_v14, %v820_v13  ;;  %v1238_v13 = vld [vmem:[%s4832_s12 + $0x18] sm:$0xff] }
  0x9c   : > { %v621_v55 = vpop.permute.xlu0 %620 }
  0x9e   : > { %v902_v19 = vpop.permute.xlu1 %901 }
  0xa0   : > { %v815_v16 = vpop.permute.xlu0 %814 }
  0xa1   : > { %v823_v17 = vmul.f32 %v821_v15, %v815_v16  ;;  %v3304_v15 = vpack.c.bf16 %v1238_v13, %v1237_v10  ;;  %v1255_v16 = vld [vmem:[%s4832_s12 + $0xa0] sm:$0xff]  ;;  %v2666_v10 = vld [vmem:[%s4832_s12 + $0x308] sm:$0xff] }
  0xa2   : > { %v2649_v13 = vld [vmem:[%s4832_s12 + $0x280] sm:$0xff] }
 0x100   : > { %v693_v56 = vpop.f32.mrb[0].mxu0 }
 0x101   : > { %v694_v57 = vadd.f32 %v693_v56, %v621_v55  ;;  %v695_v58 = vpop.f32.mrb[1].mxu0 }
 0x102   : > { %v696_v59 = vadd.f32 %v695_v58, %v621_v55  ;;  %v2642_v55 = vld [vmem:[%s4832_s12 + $0x248] sm:$0xff]  ;;  %v2660_v58 = vld [vmem:[%s4832_s12 + $0x2d8] sm:$0xff] }
 0x103   : > { %v698_v61 = vmax.f32 %v694_v57, 0.0  ;;  %v3376_v56 = vpack.c.bf16 %v2642_v55, %v2641_v54  ;;  %v2659_v57 = vld [vmem:[%s4832_s12 + $0x2d0] sm:$0xff]  ;;  %v3322_v54 = vpack.c.bf16 %v1264_v52, %v1263_v51  ;;  %v1247_v55 = vld [vmem:[%s4832_s12 + $0x60] sm:$0xff]  ;;  %v2656_v52 = vld [vmem:[%s4832_s12 + $0x2b8] sm:$0xff] }
 0x104   : > { %v699_v60 = vmax.f32 %v696_v59, 0.0  ;;  %v3378_v59 = vpack.c.bf16 %v2660_v58, %v2659_v57  ;;  %v1265_v57 = vld [vmem:[%s4832_s12 + $0xf0] sm:$0xff]  ;;  %v1266_v58 = vld [vmem:[%s4832_s12 + $0xf8] sm:$0xff] }
 0x106   : > { %796 = vmatprep.mubr.f32.mxu1 %v699_v60  ;;  %v2643_v60 = vld [vmem:[%s4832_s12 + $0x250] sm:$0xff] }
 0x107   : > { %797 = vmatmul.mubr.f32.vlgmr.msra.gmra.mrb[0].mxu1 %v698_v61  ;;  %v2644_v61 = vld [vmem:[%s4832_s12 + $0x258] sm:$0xff] }
 0x108   : > { %v3380_v63 = vpack.c.bf16 %v2644_v61, %v2643_v60  ;;  %v3326_v60 = vpack.c.bf16 %v1266_v58, %v1265_v57  ;;  %v1249_v61 = vld [vmem:[%s4832_s12 + $0x70] sm:$0xff] }
 0x1da   : > { %v2831_v0 = vpop.f32.mrb[0].mxu1 }
 0x1db   : > { %v2832_v2 = vpop.f32.mrb[1].mxu1 }
 0x1dc   : > { %v2833_v4 = vadd.f32 %v2832_v2, %v2831_v0  ;;  %v1251_v0 = vld [vmem:[%s4832_s12 + $0x80] sm:$0xff]  ;;  %v1252_v2 = vld [vmem:[%s4832_s12 + $0x88] sm:$0xff] }
 0x1de   : > { %v3296_v5 = vpack.c.bf16 %v2833_v4, %v809_v3  ;;  %v3298_v3 = vpack.c.bf16 %v1252_v2, %v1251_v0  ;;  %v1235_v4 = vld [vmem:[%s4832_s12] sm:$0xff] }
 0x1e0   : > { %3297 = vmatpush3.bf16.msra.mxu0 %v3296_v5  ;;  %v1236_v5 = vld [vmem:[%s4832_s12 + $0x8] sm:$0xff]  ;;  %3299 = vmatprep.subr.bf16.mxu1 %v3298_v3 }
 0x1e1   : > { %3113 = vmatprep.subr.mxu0 %v3632_v1 }
 0x1e3   : > { %3111 = vmatmul.mubr.msk.f32.vlgmr.msra.gmra.mrb[2].mxu0 %vm824_vm2, %v810_v6  ;;  %v3300_v6 = vpack.c.bf16 %v1236_v5, %v1235_v4  ;;  %v1283_v4 = vld [vmem:[%s4832_s12 + $0x180] sm:$0xff]  ;;  %v1284_v5 = vld [vmem:[%s4832_s12 + $0x188] sm:$0xff] }
 0x1e4   : > { %3115 = vmatprep.mubr.msk.f32.mxu0 %vm3635_vm1, %v3632_v1 }
 0x1e5   : > { %3301 = vmatpush3.bf16.msra.mxu1 %v3300_v6  ;;  %v3330_v6 = vpack.c.bf16 %v1284_v5, %v1283_v4 }
 0x1e6   : > { %3303 = vmatprep.subr.bf16.mxu1 %v3302_v9  ;;  %v2665_v9 = vld [vmem:[%s4832_s12 + $0x300] sm:$0xff] }
 0x1e9   : > { %3305 = vmatpush3.bf16.msra.mxu1 %v3304_v15 }
 0x2b6   : > { %v894_v18 = vpop.f32.mrb[2].mxu0 }
 0x2b7   : > { %v895_v20 = vadd.f32 %v894_v18, %v823_v17  ;;  %v3112_v21 = vpop.f32.mrb[3].mxu0  ;;  %v1256_v17 = vld [vmem:[%s4832_s12 + $0xa8] sm:$0xff]  ;;  %v2661_v18 = vld [vmem:[%s4832_s12 + $0x2e0] sm:$0xff] }
 0x2b8   : > { %v2645_v21 = vld [vmem:[%s4832_s12 + $0x260] sm:$0xff] }
 0x2b9   : > { %v904_v22 = vadd.f32 %v902_v19, %v895_v20  ;;  %v2662_v19 = vld [vmem:[%s4832_s12 + $0x2e8] sm:$0xff]  ;;  %v3306_v20 = vpack.c.bf16 %v1256_v17, %v1255_v16  ;;  %v3390_v16 = vpack.c.bf16 %v2666_v10, %v2665_v9 }
 0x2ba   : > { %v2650_v17 = vld [vmem:[%s4832_s12 + $0x288] sm:$0xff] }
 0x2bb   : > { %v905_v23 = vmax.f32 %v904_v22, 0.0  ;;  %v3382_v22 = vpack.c.bf16 %v2662_v19, %v2661_v18  ;;  %3307 = vmatprep.subr.bf16.mxu1 %v3306_v20  ;;  %v3392_v19 = vpack.c.bf16 %v2650_v17, %v2649_v13 }
 0x2bd   : > { %3114 = vmatpush3.msra.mxu0 %v905_v23  ;;  %v2646_v23 = vld [vmem:[%s4832_s12 + $0x268] sm:$0xff] }
 0x2be   : > { %3116 = vmatmul.mubr.msk.f32.vlgmr.msra.gmra.mrb[4].mxu0 %vm623_vm0, %v906_v24  ;;  %3375 = vmatprep.subr.bf16.mxu0 %v3374_v53  ;;  %v1239_v24 = vld [vmem:[%s4832_s12 + $0x20] sm:$0xff] }
 0x2bf   : > { %3118 = vmatprep.mubr.msk.f32.mxu0 %vm3635_vm1, %v3632_v1  ;;  %3377 = vmatpush3.bf16.msra.mxu0 %v3376_v56  ;;  %v1248_v56 = vld [vmem:[%s4832_s12 + $0x68] sm:$0xff] }
 0x2c0   : > { %3379 = vmatprep.subr.bf16.mxu0 %v3378_v59  ;;  %v3324_v59 = vpack.c.bf16 %v1248_v56, %v1247_v55 }
 0x2c2   : > { %3119 = vmatmul.mubr.msk.f32.gmra.mrb[6].mxu0 %vm623_vm0, %v907_v25  ;;  %v1240_v25 = vld [vmem:[%s4832_s12 + $0x28] sm:$0xff] }
 0x2c3   : > { %3121 = vmatprep.mubr.msk.f32.mxu0 %vm3635_vm1, %v3632_v1  ;;  %3381 = vmatpush3.bf16.msra.mxu0 %v3380_v63  ;;  %v1250_v63 = vld [vmem:[%s4832_s12 + $0x78] sm:$0xff] }
 0x2c4   : > { %3383 = vmatprep.subr.bf16.mxu0 %v3382_v22  ;;  %v3328_v2 = vpack.c.bf16 %v1250_v63, %v1249_v61 }
 0x2c6   : > { %3122 = vmatmul.mubr.msk.f32.gmra.mrb[8].mxu0 %vm623_vm0, %v908_v26  ;;  %v3384_v26 = vpack.c.bf16 %v2646_v23, %v2645_v21 }
 0x2c7   : > { %3124 = vmatprep.mubr.msk.f32.mxu0 %vm3635_vm1, %v3632_v1 }
 0x2c8   : > { %3385 = vmatpush3.bf16.msra.mxu0 %v3384_v26 }
 0x2ca   : > { %3125 = vmatmul.mubr.msk.f32.gmra.mrb[10].mxu0 %vm623_vm0, %v909_v27  ;;  %v3308_v27 = vpack.c.bf16 %v1240_v25, %v1239_v24 }
 0x2cb   : > { %3127 = vmatprep.mubr.msk.f32.mxu0 %vm3635_vm1, %v3632_v1 }
 0x2cc   : > { %3309 = vmatpush3.bf16.msra.mxu1 %v3308_v27  ;;  %v2667_v27 = vld [vmem:[%s4832_s12 + $0x310] sm:$0xff] }
 0x2ce   : > { %3128 = vmatmul.mubr.msk.f32.gmra.mrb[12].mxu0 %vm623_vm0, %v910_v28  ;;  %v1257_v28 = vld [vmem:[%s4832_s12 + $0xb0] sm:$0xff] }
 0x2cf   : > { %3130 = vmatprep.mubr.msk.f32.mxu0 %vm3635_vm1, %v3632_v1 }
 0x2d2   : > { %3131 = vmatmul.mubr.msk.f32.gmra.mrb[14].mxu0 %vm623_vm0, %v911_v29  ;;  %v1258_v29 = vld [vmem:[%s4832_s12 + $0xb8] sm:$0xff] }
 0x2d3   : > { %3133 = vmatprep.mubr.msk.f32.mxu0 %vm3635_vm1, %v3632_v1 }
 0x2d6   : > { %3134 = vmatmul.mubr.msk.f32.gmra.mrb[16].mxu0 %vm623_vm0, %v912_v30  ;;  %v3310_v30 = vpack.c.bf16 %v1258_v29, %v1257_v28  ;;  %v2668_v28 = vld [vmem:[%s4832_s12 + $0x318] sm:$0xff] }
 0x2d7   : > { %3136 = vmatprep.mubr.msk.f32.mxu0 %vm3635_vm1, %v3632_v1  ;;  %v3394_v29 = vpack.c.bf16 %v2668_v28, %v2667_v27  ;;  %v2787_v28 = vld [vmem:[%s4847_s27 + $0x10] sm:$0xff] }
 0x2d8   : > { %3311 = vmatprep.subr.bf16.mxu1 %v3310_v30  ;;  %v2651_v30 = vld [vmem:[%s4832_s12 + $0x290] sm:$0xff] }
 0x2da   : > { %3137 = vmatmul.mubr.msk.f32.gmra.mrb[18].mxu0 %vm623_vm0, %v913_v31  ;;  %v1241_v31 = vld [vmem:[%s4832_s12 + $0x30] sm:$0xff] }
 0x2db   : > { %3139 = vmatprep.mubr.msk.f32.mxu0 %vm3635_vm1, %v3632_v1 }
 0x2de   : > { %3140 = vmatmul.mubr.msk.f32.gmra.mrb[20].mxu0 %vm623_vm0, %v914_v32  ;;  %v1242_v32 = vld [vmem:[%s4832_s12 + $0x38] sm:$0xff] }
 0x2df   : > { %3142 = vmatprep.mubr.msk.f32.mxu0 %vm3635_vm1, %v3632_v1 }
 0x2e2   : > { %3143 = vmatmul.mubr.msk.f32.gmra.mrb[22].mxu0 %vm623_vm0, %v915_v33  ;;  %v1259_v33 = vld [vmem:[%s4832_s12 + $0xc0] sm:$0xff] }
 0x2e3   : > { %3145 = vmatprep.mubr.msk.f32.mxu0 %vm3635_vm1, %v3632_v1 }
 0x2e6   : > { %3146 = vmatmul.mubr.msk.f32.gmra.mrb[24].mxu0 %vm623_vm0, %v916_v34  ;;  %v3312_v34 = vpack.c.bf16 %v1242_v32, %v1241_v31  ;;  %v2652_v31 = vld [vmem:[%s4832_s12 + $0x298] sm:$0xff] }
 0x2e7   : > { %3148 = vmatprep.mubr.msk.f32.mxu0 %vm3635_vm1, %v3632_v1 }
 0x2e8   : > { %3313 = vmatpush3.bf16.msra.mxu1 %v3312_v34 }
 0x2ea   : > { %3149 = vmatmul.mubr.msk.f32.gmra.mrb[26].mxu0 %vm623_vm0, %v917_v35  ;;  %v1260_v35 = vld [vmem:[%s4832_s12 + $0xc8] sm:$0xff] }
 0x2eb   : > { %3151 = vmatprep.mubr.msk.f32.mxu0 %vm3635_vm1, %v3632_v1 }
 0x2ee   : > { %3152 = vmatmul.mubr.msk.f32.gmra.mrb[28].mxu0 %vm623_vm0, %v918_v36  ;;  %v1243_v36 = vld [vmem:[%s4832_s12 + $0x40] sm:$0xff] }
 0x2ef   : > { %3154 = vmatprep.mubr.msk.f32.mxu0 %vm3635_vm1, %v3632_v1 }
 0x2f2   : > { %3155 = vmatmul.mubr.msk.f32.gmra.mrb[30].mxu0 %vm623_vm0, %v919_v37  ;;  %v1244_v37 = vld [vmem:[%s4832_s12 + $0x48] sm:$0xff] }
 0x2f3   : > { %3157 = vmatprep.mubr.msk.f32.mxu0 %vm3635_vm1, %v3632_v1 }
 0x2f6   : > { %3158 = vmatmul.mubr.msk.f32.gmra.mrb[32].mxu0 %vm623_vm0, %v920_v38  ;;  %v3314_v38 = vpack.c.bf16 %v1260_v35, %v1259_v33  ;;  %v3396_v33 = vpack.c.bf16 %v2652_v31, %v2651_v30 }
 0x2f7   : > { %3160 = vmatprep.mubr.msk.f32.mxu0 %vm3635_vm1, %v3632_v1 }
 0x2f8   : > { %3315 = vmatprep.subr.bf16.mxu1 %v3314_v38  ;;  %v2669_v38 = vld [vmem:[%s4832_s12 + $0x320] sm:$0xff] }
 0x2fa   : > { %3161 = vmatmul.mubr.msk.f32.gmra.mrb[34].mxu0 %vm623_vm0, %v921_v39  ;;  %v1261_v39 = vld [vmem:[%s4832_s12 + $0xd0] sm:$0xff] }
 0x2fb   : > { %3163 = vmatprep.mubr.msk.f32.mxu0 %vm3635_vm1, %v3632_v1 }
 0x2fe   : > { %3164 = vmatmul.mubr.msk.f32.gmra.mrb[36].mxu0 %vm623_vm0, %v922_v40  ;;  %v1262_v40 = vld [vmem:[%s4832_s12 + $0xd8] sm:$0xff] }
 0x2ff   : > { %3166 = vmatprep.mubr.msk.f32.mxu0 %vm3635_vm1, %v3632_v1 }
 0x302   : > { %3167 = vmatmul.mubr.msk.f32.gmra.mrb[38].mxu0 %vm623_vm0, %v923_v41  ;;  %v2663_v41 = vld [vmem:[%s4832_s12 + $0x2f0] sm:$0xff] }
 0x303   : > { %3169 = vmatprep.mubr.msk.f32.mxu0 %vm3635_vm1, %v3632_v1 }
 0x306   : > { %3170 = vmatmul.mubr.msk.f32.gmra.mrb[40].mxu0 %vm623_vm0, %v924_v42  ;;  %v2664_v42 = vld [vmem:[%s4832_s12 + $0x2f8] sm:$0xff] }
 0x307   : > { %3172 = vmatprep.mubr.msk.f32.mxu0 %vm3635_vm1, %v3632_v1 }
 0x30a   : > { %3173 = vmatmul.mubr.msk.f32.gmra.mrb[42].mxu0 %vm623_vm0, %v925_v43  ;;  %v3316_v43 = vpack.c.bf16 %v1244_v37, %v1243_v36 }
 0x30b   : > { %3175 = vmatprep.mubr.msk.f32.mxu0 %vm3635_vm1, %v3632_v1 }
 0x30c   : > { %3317 = vmatpush3.bf16.msra.mxu1 %v3316_v43  ;;  %v2653_v43 = vld [vmem:[%s4832_s12 + $0x2a0] sm:$0xff] }
 0x30e   : > { %3176 = vmatmul.mubr.msk.f32.gmra.mrb[44].mxu0 %vm623_vm0, %v926_v44  ;;  %v3386_v44 = vpack.c.bf16 %v2664_v42, %v2663_v41 }
 0x30f   : > { %3178 = vmatprep.mubr.msk.f32.mxu0 %vm3635_vm1, %v3632_v1 }
 0x310   : > { %3387 = vmatprep.subr.bf16.mxu0 %v3386_v44  ;;  %v2654_v44 = vld [vmem:[%s4832_s12 + $0x2a8] sm:$0xff] }
 0x312   : > { %3179 = vmatmul.mubr.msk.f32.gmra.mrb[46].mxu0 %vm623_vm0, %v927_v45  ;;  %v2647_v45 = vld [vmem:[%s4832_s12 + $0x270] sm:$0xff] }
 0x313   : > { %3181 = vmatprep.mubr.msk.f32.mxu0 %vm3635_vm1, %v3632_v1 }
 0x316   : > { %3182 = vmatmul.mubr.msk.f32.gmra.mrb[48].mxu0 %vm623_vm0, %v928_v46  ;;  %v2648_v46 = vld [vmem:[%s4832_s12 + $0x278] sm:$0xff] }
 0x317   : > { %3184 = vmatprep.mubr.msk.f32.mxu0 %vm3635_vm1, %v3632_v1 }
 0x31a   : > { %3185 = vmatmul.mubr.msk.f32.gmra.mrb[50].mxu0 %vm623_vm0, %v929_v47  ;;  %v3318_v47 = vpack.c.bf16 %v1262_v40, %v1261_v39  ;;  %v2670_v40 = vld [vmem:[%s4832_s12 + $0x328] sm:$0xff] }
 0x31b   : > { %3187 = vmatprep.mubr.msk.f32.mxu0 %vm3635_vm1, %v3632_v1  ;;  %v3398_v42 = vpack.c.bf16 %v2670_v40, %v2669_v38  ;;  %v2713_v38 = vld [vmem:[%s4847_s27 + $0x8] sm:$0xff]  ;;  %v2159_v40 = vld [vmem:[%s4834_s14] sm:$0xff] }
 0x31c   : > { %3319 = vmatprep.subr.bf16.mxu1 %v3318_v47  ;;  %v2672_v47 = vld [vmem:[%s4832_s12 + $0x338] sm:$0xff] }
 0x31e   : > { %3188 = vmatmul.mubr.msk.f32.gmra.mrb[52].mxu0 %vm623_vm0, %v930_v48  ;;  %v1245_v48 = vld [vmem:[%s4832_s12 + $0x50] sm:$0xff] }
 0x31f   : > { %3190 = vmatprep.mubr.msk.f32.mxu0 %vm3635_vm1, %v3632_v1 }
 0x322   : > { %3191 = vmatmul.mubr.msk.f32.gmra.mrb[54].mxu0 %vm623_vm0, %v931_v49  ;;  %v1246_v49 = vld [vmem:[%s4832_s12 + $0x58] sm:$0xff] }
 0x323   : > { %3193 = vmatprep.mubr.msk.f32.mxu0 %vm3635_vm1, %v3632_v1  ;;  %v3320_v53 = vpack.c.bf16 %v1246_v49, %v1245_v48 }
 0x325   : > { %3321 = vmatpush3.bf16.msra.mxu1 %v3320_v53 }
 0x326   : > { %3194 = vmatmul.mubr.msk.f32.gmra.mrb[56].mxu0 %vm623_vm0, %v932_v50  ;;  %v3388_v50 = vpack.c.bf16 %v2648_v46, %v2647_v45  ;;  %3323 = vmatprep.subr.bf16.mxu1 %v3322_v54  ;;  %v3400_v45 = vpack.c.bf16 %v2654_v44, %v2653_v43  ;;  %v2671_v46 = vld [vmem:[%s4832_s12 + $0x330] sm:$0xff]  ;;  %v1267_v43 = vld [vmem:[%s4832_s12 + $0x100] sm:$0xff]  ;;  %v1268_v44 = vld [vmem:[%s4832_s12 + $0x108] sm:$0xff] }
 0x327   : > { %v3402_v49 = vpack.c.bf16 %v2672_v47, %v2671_v46  ;;  %v1285_v46 = vld [vmem:[%s4832_s12 + $0x190] sm:$0xff]  ;;  %v1286_v47 = vld [vmem:[%s4832_s12 + $0x198] sm:$0xff] }
 0x328   : > { %3389 = vmatpush3.bf16.msra.mxu0 %v3388_v50  ;;  %v2655_v50 = vld [vmem:[%s4832_s12 + $0x2b0] sm:$0xff] }
 0x329   : > { %3325 = vmatpush3.bf16.msra.mxu1 %v3324_v59  ;;  %3391 = vmatprep.subr.bf16.mxu0 %v3390_v16  ;;  %v3404_v53 = vpack.c.bf16 %v2656_v52, %v2655_v50 }
 0x32a   : > { %3327 = vmatprep.subr.bf16.mxu1 %v3326_v60 }
 0x32c   : > { %3393 = vmatpush3.bf16.msra.mxu0 %v3392_v19 }
 0x32d   : > { %3329 = vmatpush3.bf16.msra.mxu1 %v3328_v2  ;;  %3395 = vmatprep.subr.bf16.mxu0 %v3394_v29 }
 0x32e   : > { %3331 = vmatprep.subr.bf16.mxu1 %v3330_v6 }
 0x330   : > { %3397 = vmatpush3.bf16.msra.mxu0 %v3396_v33  ;;  %v2240_v33 = vld [vmem:[%s4836_s16] sm:$0x7f] }
 0x331   : > { %3399 = vmatprep.subr.bf16.mxu0 %v3398_v42 }
 0x334   : > { %3401 = vmatpush3.bf16.msra.mxu0 %v3400_v45 }
 0x335   : > { %3403 = vmatprep.subr.bf16.mxu0 %v3402_v49 }
 0x338   : > { %3405 = vmatpush3.bf16.msra.mxu0 %v3404_v53 }
 0x339   : > { %3438 = vmatprep.subr.bf16.mxu0 %v3634_v62 }
 0x391   : > { %v4129_v0 = vpop.f32.mrb[4].mxu0 }
 0x392   : > { %v3117_v3 = vpop.f32.mrb[5].mxu0 }
 0x395   : > { %v1085_v7 = vpop.f32.mrb[6].mxu0 }
 0x396   : > { %v3120_v8 = vpop.f32.mrb[7].mxu0 }
 0x399   : > { %v4146_v15 = vpop.f32.mrb[8].mxu0 }
 0x39a   : > { %v3123_v18 = vpop.f32.mrb[9].mxu0 }
 0x39d   : > { %v1095_v20 = vpop.f32.mrb[10].mxu0 }
 0x39e   : > { %v3575_v21 = vpack.i.bf16 %v1085_v7, %v1095_v20  ;;  %v3126_v22 = vpop.f32.mrb[11].mxu0 }
 0x3a0   : > { %3576 = vrot.lane.b32.xlu1 %v3575_v21, %s3636_s26 }
 0x3a1   : > { %v4152_v23 = vpop.f32.mrb[12].mxu0 }
 0x3a2   : > { %v3129_v24 = vpop.f32.mrb[13].mxu0 }
 0x3a5   : > { %v1105_v25 = vpop.f32.mrb[14].mxu0 }
 0x3a6   : > { %v3132_v26 = vpop.f32.mrb[15].mxu0 }
 0x3a9   : > { %v4166_v32 = vpop.f32.mrb[16].mxu0 }
 0x3aa   : > { %v3135_v34 = vpop.f32.mrb[17].mxu0 }
 0x3ad   : > { %v1115_v35 = vpop.f32.mrb[18].mxu0 }
 0x3ae   : > { %v3580_v36 = vpack.i.bf16 %v1105_v25, %v1115_v35  ;;  %v3138_v37 = vpop.f32.mrb[19].mxu0  ;;  %v1307_v25 = vld [vmem:[%s4847_s27] sm:$0xff] }
 0x3b0   : > { %3581 = vrot.lane.b32.xlu0 %v3580_v36, %s3636_s26 }
 0x3b1   : > { %v4172_v39 = vpop.f32.mrb[20].mxu0 }
 0x3b2   : > { %v3141_v41 = vpop.f32.mrb[21].mxu0 }
 0x3b5   : > { %v4189_v48 = vpop.f32.mrb[22].mxu0 }
 0x3b6   : > { %v3144_v51 = vpop.f32.mrb[23].mxu0 }
 0x3b7   : > { %v3332_v51 = vpack.c.bf16 %v1268_v44, %v1267_v43  ;;  %v1298_v43 = vld [vmem:[%s4832_s12 + $0x1f8] sm:$0xff] }
 0x3b9   : > { %v1130_v54 = vpop.f32.mrb[24].mxu0 }
 0x3ba   : > { %v3147_v55 = vpop.f32.mrb[25].mxu0 }
 0x3bb   : > { %v1269_v55 = vld [vmem:[%s4832_s12 + $0x110] sm:$0xff] }
 0x3bd   : > { %v4198_v56 = vpop.f32.mrb[26].mxu0 }
 0x3be   : > { %v3150_v57 = vpop.f32.mrb[27].mxu0 }
 0x3bf   : > { %v1270_v57 = vld [vmem:[%s4832_s12 + $0x118] sm:$0xff] }
 0x3c1   : > { %v1140_v58 = vpop.f32.mrb[28].mxu0 }
 0x3c2   : > { %v3585_v59 = vpack.i.bf16 %v1130_v54, %v1140_v58  ;;  %v3153_v60 = vpop.f32.mrb[29].mxu0  ;;  %v3334_v54 = vpack.c.bf16 %v1286_v47, %v1285_v46  ;;  %v1287_v58 = vld [vmem:[%s4832_s12 + $0x1a0] sm:$0xff]  ;;  %v1281_v46 = vld [vmem:[%s4832_s12 + $0x170] sm:$0xff]  ;;  %v1282_v47 = vld [vmem:[%s4832_s12 + $0x178] sm:$0xff] }
 0x3c3   : > { %v1271_v60 = vld [vmem:[%s4832_s12 + $0x120] sm:$0xff] }
 0x3c4   : > { %3586 = vrot.lane.b32.xlu1 %v3585_v59, %s3636_s26 }
 0x3c5   : > { %v4201_v61 = vpop.f32.mrb[30].mxu0 }
 0x3c6   : > { %v3156_v63 = vpop.f32.mrb[31].mxu0 }
 0x3c7   : > { %v1272_v63 = vld [vmem:[%s4832_s12 + $0x128] sm:$0xff] }
 0x3c9   : > { %v1150_v2 = vpop.f32.mrb[32].mxu0 }
 0x3ca   : > { %v3159_v3 = vpop.f32.mrb[33].mxu0 }
 0x3cb   : > { %v1290_v3 = vld [vmem:[%s4832_s12 + $0x1b8] sm:$0xff] }
 0x3cd   : > { %v4203_v4 = vpop.f32.mrb[34].mxu0 }
 0x3ce   : > { %v3162_v5 = vpop.f32.mrb[35].mxu0 }
 0x3cf   : > { %v3340_v5 = vpack.c.bf16 %v1272_v63, %v1271_v60 }
 0x3d1   : > { %v1160_v6 = vpop.f32.mrb[36].mxu0 }
 0x3d2   : > { %v3590_v7 = vpack.i.bf16 %v1150_v2, %v1160_v6  ;;  %v3165_v8 = vpop.f32.mrb[37].mxu0  ;;  %v1289_v2 = vld [vmem:[%s4832_s12 + $0x1b0] sm:$0xff] }
 0x3d3   : > { %v3342_v6 = vpack.c.bf16 %v1290_v3, %v1289_v2  ;;  %v1274_v8 = vld [vmem:[%s4832_s12 + $0x138] sm:$0xff]  ;;  %v1303_v3 = vld [vmem:[%s4832_s12 + $0x220] sm:$0xff] }
 0x3d4   : > { %3591 = vrot.lane.b32.xlu0 %v3590_v7, %s3636_s26  ;;  %v1273_v7 = vld [vmem:[%s4832_s12 + $0x130] sm:$0xff] }
 0x3d5   : > { %v4206_v9 = vpop.f32.mrb[38].mxu0 }
 0x3d6   : > { %v3168_v10 = vpop.f32.mrb[39].mxu0 }
 0x3d7   : > { %v1291_v10 = vld [vmem:[%s4832_s12 + $0x1c0] sm:$0xff] }
 0x3d9   : > { %v4208_v13 = vpop.f32.mrb[40].mxu0 }
 0x3da   : > { %v3171_v16 = vpop.f32.mrb[41].mxu0 }
 0x3db   : > { %v1292_v16 = vld [vmem:[%s4832_s12 + $0x1c8] sm:$0xff] }
 0x3dd   : > { %v1175_v17 = vpop.f32.mrb[42].mxu0 }
 0x3de   : > { %v3174_v18 = vpop.f32.mrb[43].mxu0 }
 0x3df   : > { %v3346_v18 = vpack.c.bf16 %v1292_v16, %v1291_v10  ;;  %v1306_v16 = vld [vmem:[%s4832_s12 + $0x238] sm:$0xff] }
 0x3e1   : > { %v4210_v19 = vpop.f32.mrb[44].mxu0 }
 0x3e2   : > { %v3177_v20 = vpop.f32.mrb[45].mxu0 }
 0x3e3   : > { %v1275_v20 = vld [vmem:[%s4832_s12 + $0x140] sm:$0xff] }
 0x3e5   : > { %v1185_v21 = vpop.f32.mrb[46].mxu0 }
 0x3e6   : > { %v3595_v22 = vpack.i.bf16 %v1175_v17, %v1185_v21  ;;  %v3180_v24 = vpop.f32.mrb[47].mxu0  ;;  %v3344_v17 = vpack.c.bf16 %v1274_v8, %v1273_v7  ;;  %v1276_v21 = vld [vmem:[%s4832_s12 + $0x148] sm:$0xff]  ;;  %v2707_v7 = vld [vmem:[%s4832_s12 + $0x450] sm:$0xff]  ;;  %v2708_v8 = vld [vmem:[%s4832_s12 + $0x458] sm:$0xff] }
 0x3e7   : > { %v1293_v24 = vld [vmem:[%s4832_s12 + $0x1d0] sm:$0xff]  ;;  %v3442_v10 = vpack.c.bf16 %v2708_v8, %v2707_v7 }
 0x3e8   : > { %3596 = vrot.lane.b32.xlu1 %v3595_v22, %s3636_s26 }
 0x3e9   : > { %v4216_v26 = vpop.f32.mrb[48].mxu0 }
 0x3ea   : > { %v3183_v27 = vpop.f32.mrb[49].mxu0 }
 0x3ec   : > { %1310 = vperm.xlu1 %3574, %v1307_v25   ;;  %v1294_v25 = vld [vmem:[%s4832_s12 + $0x1d8] sm:$0xff] }
 0x3ed   : > { %v1195_v29 = vpop.f32.mrb[50].mxu0 }
 0x3ee   : > { %v3186_v30 = vpop.f32.mrb[51].mxu0 }
 0x3ef   : > { %v3350_v30 = vpack.c.bf16 %v1294_v25, %v1293_v24  ;;  %v2673_v25 = vld [vmem:[%s4832_s12 + $0x340] sm:$0xff] }
 0x3f0   : > { %1940 = vperm.xlu1 %3574, %v2787_v28   ;;  %v3348_v28 = vpack.c.bf16 %v1276_v21, %v1275_v20  ;;  %v2689_v20 = vld [vmem:[%s4832_s12 + $0x3c0] sm:$0xff]  ;;  %v2690_v21 = vld [vmem:[%s4832_s12 + $0x3c8] sm:$0xff] }
 0x3f1   : > { %v4221_v31 = vpop.f32.mrb[52].mxu0 }
 0x3f2   : > { %v3189_v34 = vpop.f32.mrb[53].mxu0 }
 0x3f3   : > { %v1278_v34 = vld [vmem:[%s4832_s12 + $0x158] sm:$0xff] }
 0x3f4   : > { %2243 = vperm.xlu1 %3574, %v2240_v33   ;;  %v1277_v33 = vld [vmem:[%s4832_s12 + $0x150] sm:$0xff] }
 0x3f5   : > { %v1205_v35 = vpop.f32.mrb[54].mxu0 }
 0x3f6   : > { %v3600_v36 = vpack.i.bf16 %v1195_v29, %v1205_v35  ;;  %v3192_v37 = vpop.f32.mrb[55].mxu0  ;;  %v1295_v35 = vld [vmem:[%s4832_s12 + $0x1e0] sm:$0xff] }
 0x3f8   : > { %3601 = vrot.lane.b32.xlu0 %v3600_v36, %s3636_s26  ;;  %v1296_v36 = vld [vmem:[%s4832_s12 + $0x1e8] sm:$0xff] }
 0x3f9   : > { %v4233_v41 = vpop.f32.mrb[56].mxu0  ;;  %v3354_v37 = vpack.c.bf16 %v1296_v36, %v1295_v35  ;;  %v2731_v35 = vld [vmem:[%s4832_s12 + $0x500] sm:$0xff]  ;;  %v2732_v36 = vld [vmem:[%s4832_s12 + $0x508] sm:$0xff] }
 0x3fa   : > { %v3195_v42 = vpop.f32.mrb[57].mxu0 }
 0x3fb   : > { %v1297_v42 = vld [vmem:[%s4832_s12 + $0x1f0] sm:$0xff] }
 0x3fc   : > { %1625 = vperm.xlu0 %3573, %v2713_v38   ;;  %v1279_v38 = vld [vmem:[%s4832_s12 + $0x160] sm:$0xff] }
 0x400   : > { %2162 = vperm.xlu0 %3573, %v2159_v40   ;;  %v1280_v40 = vld [vmem:[%s4832_s12 + $0x168] sm:$0xff] }
 0x401   : > { %v3356_v44 = vpack.c.bf16 %v1280_v40, %v1279_v38  ;;  %v2675_v38 = vld [vmem:[%s4832_s12 + $0x350] sm:$0xff]  ;;  %v2676_v40 = vld [vmem:[%s4832_s12 + $0x358] sm:$0xff] }
 0x412   : > { %v3577_v45 = vpop.permute.xlu1 %3576 }
 0x413   : > { %v3579_v49 = vunpack.i.h.bf16 %v3577_v45  ;;  %v3578_v50 = vunpack.i.l.bf16 %v3577_v45  ;;  %v3358_v45 = vpack.c.bf16 %v1298_v43, %v1297_v42  ;;  %v3450_v43 = vpack.c.bf16 %v2732_v36, %v2731_v35 }
 0x415   : > { %v1232_v52 = vsel %vm1230_vm3, %v4146_v15, %v3578_v50  ;;  %v1231_v53 = vsel %vm1230_vm3, %v4129_v0, %v3579_v49  ;;  %v1288_v15 = vld [vmem:[%s4832_s12 + $0x1a8] sm:$0xff]  ;;  %v3336_v0 = vpack.c.bf16 %v1270_v57, %v1269_v55  ;;  %v3360_v49 = vpack.c.bf16 %v1282_v47, %v1281_v46  ;;  %v1299_v50 = vld [vmem:[%s4832_s12 + $0x200] sm:$0xff]  ;;  %v1302_v55 = vld [vmem:[%s4832_s12 + $0x218] sm:$0xff] }
 0x416   : > { %1380 = vmatprep.mubr.f32.mxu1 %v1232_v52  ;;  %v3338_v59 = vpack.c.bf16 %v1288_v15, %v1287_v58  ;;  %v2705_v57 = vld [vmem:[%s4832_s12 + $0x440] sm:$0xff]  ;;  %v2706_v58 = vld [vmem:[%s4832_s12 + $0x448] sm:$0xff] }
 0x417   : > { %1381 = vmatmul.mubr.f32.vlgmr.msra.gmra.mrb[2].mxu1 %v1231_v53  ;;  %v3439_v2 = vpack.c.bf16 %v2706_v58, %v2705_v57  ;;  %v2693_v46 = vld [vmem:[%s4832_s12 + $0x3e0] sm:$0xff]  ;;  %v2678_v57 = vld [vmem:[%s4832_s12 + $0x368] sm:$0xff] }
 0x418   : > { %3333 = vmatpush3.bf16.msra.mxu1 %v3332_v51  ;;  %v1300_v51 = vld [vmem:[%s4832_s12 + $0x208] sm:$0xff] }
 0x419   : > { %3335 = vmatprep.subr.bf16.mxu1 %v3334_v54  ;;  %v3363_v53 = vpack.c.bf16 %v1300_v51, %v1299_v50  ;;  %v1301_v54 = vld [vmem:[%s4832_s12 + $0x210] sm:$0xff]  ;;  %v2734_v51 = vld [vmem:[%s4832_s12 + $0x518] sm:$0xff] }
 0x41a   : > { %v3366_v63 = vpack.c.bf16 %v1302_v55, %v1301_v54  ;;  %v2733_v50 = vld [vmem:[%s4832_s12 + $0x510] sm:$0xff]  ;;  %v2677_v55 = vld [vmem:[%s4832_s12 + $0x360] sm:$0xff] }
 0x41c   : > { %3337 = vmatpush3.bf16.msra.mxu1 %v3336_v0 }
 0x41d   : > { %3339 = vmatprep.subr.bf16.mxu1 %v3338_v59 }
 0x420   : > { %3341 = vmatpush3.bf16.msra.mxu1 %v3340_v5 }
 0x421   : > { %3343 = vmatprep.subr.bf16.mxu1 %v3342_v6  ;;  %v1304_v6 = vld [vmem:[%s4832_s12 + $0x228] sm:$0xff] }
 0x422   : > { %v3582_v22 = vpop.permute.xlu0 %3581 }
 0x423   : > { %v3583_v27 = vunpack.i.l.bf16 %v3582_v22  ;;  %v3584_v52 = vunpack.i.h.bf16 %v3582_v22 }
 0x424   : > { %3345 = vmatpush3.bf16.msra.mxu1 %v3344_v17  ;;  %v2709_v17 = vld [vmem:[%s4832_s12 + $0x460] sm:$0xff] }
 0x425   : > { %3347 = vmatprep.subr.bf16.mxu1 %v3346_v18  ;;  %v1234_v29 = vsel %vm1230_vm3, %v4166_v32, %v3583_v27  ;;  %v3352_v32 = vpack.c.bf16 %v1278_v34, %v1277_v33  ;;  %v1233_v15 = vsel %vm1230_vm3, %v4152_v23, %v3584_v52  ;;  %v2710_v18 = vld [vmem:[%s4832_s12 + $0x468] sm:$0xff]  ;;  %v2691_v33 = vld [vmem:[%s4832_s12 + $0x3d0] sm:$0xff]  ;;  %v2692_v34 = vld [vmem:[%s4832_s12 + $0x3d8] sm:$0xff] }
 0x426   : > { %1450 = vmatprep.mubr.f32.mxu1 %v1234_v29  ;;  %v3445_v24 = vpack.c.bf16 %v2710_v18, %v2709_v17  ;;  %v2674_v27 = vld [vmem:[%s4832_s12 + $0x348] sm:$0xff]  ;;  %v2711_v29 = vld [vmem:[%s4832_s12 + $0x470] sm:$0xff]  ;;  %v3410_v42 = vpack.c.bf16 %v2692_v34, %v2691_v33  ;;  %v2738_v17 = vld [vmem:[%s4832_s12 + $0x538] sm:$0xff] }
 0x427   : > { %v2739_v33 = vld [vmem:[%s4832_s12 + $0x540] sm:$0xff]  ;;  %v2740_v34 = vld [vmem:[%s4832_s12 + $0x548] sm:$0xff] }
 0x428   : > { %3349 = vmatpush3.bf16.msra.mxu1 %v3348_v28  ;;  %v3406_v28 = vpack.c.bf16 %v2690_v21, %v2689_v20  ;;  %v2681_v21 = vld [vmem:[%s4832_s12 + $0x380] sm:$0xff] }
 0x429   : > { %3351 = vmatprep.subr.bf16.mxu1 %v3350_v30  ;;  %v2712_v30 = vld [vmem:[%s4832_s12 + $0x478] sm:$0xff] }
 0x42c   : > { %3353 = vmatpush3.bf16.msra.mxu1 %v3352_v32  ;;  %v3408_v32 = vpack.c.bf16 %v2674_v27, %v2673_v25  ;;  %v2721_v27 = vld [vmem:[%s4832_s12 + $0x4b0] sm:$0xff] }
 0x42d   : > { %3355 = vmatprep.subr.bf16.mxu1 %v3354_v37  ;;  %v3448_v37 = vpack.c.bf16 %v2712_v30, %v2711_v29  ;;  %v2699_v29 = vld [vmem:[%s4832_s12 + $0x410] sm:$0xff]  ;;  %v2700_v30 = vld [vmem:[%s4832_s12 + $0x418] sm:$0xff] }
 0x430   : > { %3357 = vmatpush3.bf16.msra.mxu1 %v3356_v44  ;;  %v2715_v44 = vld [vmem:[%s4832_s12 + $0x480] sm:$0xff] }
 0x431   : > { %3359 = vmatprep.subr.bf16.mxu1 %v3358_v45  ;;  %v2716_v45 = vld [vmem:[%s4832_s12 + $0x488] sm:$0xff] }
 0x432   : > { %v3452_v54 = vpack.c.bf16 %v2716_v45, %v2715_v44  ;;  %v2701_v44 = vld [vmem:[%s4832_s12 + $0x420] sm:$0xff]  ;;  %v2702_v45 = vld [vmem:[%s4832_s12 + $0x428] sm:$0xff] }
 0x434   : > { %3361 = vmatpush3.bf16.msra.mxu1 %v3360_v49  ;;  %v2694_v49 = vld [vmem:[%s4832_s12 + $0x3e8] sm:$0xff] }
 0x435   : > { %3362 = vmatprep.subr.bf16.mxu1 %v3634_v62 }
 0x436   : > { %v3587_v0 = vpop.permute.xlu1 %3586 }
 0x437   : > { %1451 = vmatmul.mubr.f32.vlgmr.msra.gmra.mrb[4].mxu1 %v1233_v15  ;;  %v3589_v59 = vunpack.i.h.bf16 %v3587_v0  ;;  %v3588_v60 = vunpack.i.l.bf16 %v3587_v0  ;;  %v3454_v15 = vpack.c.bf16 %v2734_v51, %v2733_v50  ;;  %v2717_v0 = vld [vmem:[%s4832_s12 + $0x490] sm:$0xff] }
 0x438   : > { %3364 = vmatpush3.bf16.msra.mxu1 %v3363_v53  ;;  %3212 = vmatprep.mubr.msk.f32.mxu1 %vm3635_vm1, %v3632_v1  ;;  %v3412_v53 = vpack.c.bf16 %v2676_v40, %v2675_v38  ;;  %v3426_v38 = vpack.c.bf16 %v2700_v30, %v2699_v29  ;;  %v3466_v40 = vpack.c.bf16 %v2740_v34, %v2739_v33  ;;  %v2766_v29 = vld [vmem:[%s4832_s12 + $0x618] sm:$0xff]  ;;  %v2749_v34 = vld [vmem:[%s4832_s12 + $0x590] sm:$0xff] }
 0x439   : > { %3365 = vmatprep.subr.bf16.mxu1 %v3634_v62  ;;  %v1545_v5 = vsel %vm1230_vm3, %v4198_v56, %v3588_v60  ;;  %v1544_v23 = vsel %vm1230_vm3, %v4189_v48, %v3589_v59  ;;  %v3369_v56 = vpack.c.bf16 %v1304_v6, %v1303_v3  ;;  %v1305_v48 = vld [vmem:[%s4832_s12 + $0x230] sm:$0xff]  ;;  %v2718_v59 = vld [vmem:[%s4832_s12 + $0x498] sm:$0xff]  ;;  %v3416_v3 = vpack.c.bf16 %v2678_v57, %v2677_v55 }
 0x43a   : > { %1695 = vmatprep.mubr.f32.mxu0 %v1545_v5  ;;  %v3372_v22 = vpack.c.bf16 %v1306_v16, %v1305_v48  ;;  %v2695_v60 = vld [vmem:[%s4832_s12 + $0x3f0] sm:$0xff]  ;;  %v3456_v5 = vpack.c.bf16 %v2718_v59, %v2717_v0  ;;  %v2680_v6 = vld [vmem:[%s4832_s12 + $0x378] sm:$0xff]  ;;  %v2698_v48 = vld [vmem:[%s4832_s12 + $0x408] sm:$0xff] }
 0x43b   : > { %1696 = vmatmul.mubr.f32.vlgmr.msra.gmra.mrb[58].mxu0 %v1544_v23  ;;  %v2679_v23 = vld [vmem:[%s4832_s12 + $0x370] sm:$0xff]  ;;  %v2704_v0 = vld [vmem:[%s4832_s12 + $0x438] sm:$0xff]  ;;  %v2743_v59 = vld [vmem:[%s4832_s12 + $0x560] sm:$0xff] }
 0x43c   : > { %3367 = vmatpush3.bf16.msra.mxu1 %v3366_v63  ;;  %3440 = vmatpush3.bf16.msra.mxu0 %v3439_v2  ;;  %v2735_v63 = vld [vmem:[%s4832_s12 + $0x520] sm:$0xff]  ;;  %v2736_v2 = vld [vmem:[%s4832_s12 + $0x528] sm:$0xff]  ;;  %v2737_v16 = vld [vmem:[%s4832_s12 + $0x530] sm:$0xff]  ;;  %v3420_v18 = vpack.c.bf16 %v2680_v6, %v2679_v23 }
 0x43d   : > { %3368 = vmatprep.subr.bf16.mxu1 %v3634_v62  ;;  %3441 = vmatprep.subr.bf16.mxu0 %v3634_v62  ;;  %v3458_v8 = vpack.c.bf16 %v2736_v2, %v2735_v63  ;;  %v3462_v25 = vpack.c.bf16 %v2738_v17, %v2737_v16  ;;  %v2725_v57 = vld [vmem:[%s4832_s12 + $0x4d0] sm:$0xff] }
 0x43e   : > { %3231 = vmatprep.mubr.msk.f32.mxu0 %vm3635_vm1, %v3632_v1 }
 0x440   : > { %3370 = vmatpush3.bf16.msra.mxu1 %v3369_v56  ;;  %3443 = vmatpush3.bf16.msra.mxu0 %v3442_v10  ;;  %v2720_v56 = vld [vmem:[%s4832_s12 + $0x4a8] sm:$0xff]  ;;  %v2697_v10 = vld [vmem:[%s4832_s12 + $0x400] sm:$0xff] }
 0x441   : > { %3371 = vmatprep.subr.bf16.mxu1 %v3634_v62  ;;  %3444 = vmatprep.subr.bf16.mxu0 %v3634_v62 }
 0x444   : > { %3373 = vmatpush3.bf16.msra.mxu1 %v3372_v22  ;;  %3446 = vmatpush3.bf16.msra.mxu0 %v3445_v24  ;;  %v2682_v22 = vld [vmem:[%s4832_s12 + $0x388] sm:$0xff]  ;;  %v3422_v24 = vpack.c.bf16 %v2698_v48, %v2697_v10  ;;  %v2746_v10 = vld [vmem:[%s4832_s12 + $0x578] sm:$0xff] }
 0x445   : > { %3407 = vmatprep.subr.bf16.mxu1 %v3406_v28  ;;  %3447 = vmatprep.subr.bf16.mxu0 %v3634_v62  ;;  %v2722_v28 = vld [vmem:[%s4832_s12 + $0x4b8] sm:$0xff]  ;;  %v3424_v35 = vpack.c.bf16 %v2682_v22, %v2681_v21  ;;  %v2764_v48 = vld [vmem:[%s4832_s12 + $0x608] sm:$0xff] }
 0x446   : > { %v4435_v47 = vpop.permute.xlu0 %3591  ;;  %v3464_v36 = vpack.c.bf16 %v2722_v28, %v2721_v27  ;;  %v2730_v22 = vld [vmem:[%s4832_s12 + $0x4f8] sm:$0xff]  ;;  %v2765_v28 = vld [vmem:[%s4832_s12 + $0x610] sm:$0xff] }
 0x447   : > { %3213 = vmatmul.mubr.msk.f32.vlgmr.msra.gmra.mrb[6].mxu1 %vm1230_vm3, %v4172_v39  ;;  %v3593_v52 = vunpack.i.l.bf16 %v4435_v47  ;;  %v3414_v39 = vpack.c.bf16 %v2694_v49, %v2693_v46  ;;  %v2741_v46 = vld [vmem:[%s4832_s12 + $0x550] sm:$0xff]  ;;  %v2742_v49 = vld [vmem:[%s4832_s12 + $0x558] sm:$0xff]  ;;  %v3594_v27 = vunpack.i.h.bf16 %v4435_v47 }
 0x448   : > { %3409 = vmatpush3.bf16.msra.mxu1 %v3408_v32  ;;  %3449 = vmatpush3.bf16.msra.mxu0 %v3448_v37  ;;  %v2683_v32 = vld [vmem:[%s4832_s12 + $0x390] sm:$0xff]  ;;  %v2684_v37 = vld [vmem:[%s4832_s12 + $0x398] sm:$0xff]  ;;  %v3470_v55 = vpack.c.bf16 %v2742_v49, %v2741_v46 }
 0x449   : > { %3411 = vmatprep.subr.bf16.mxu1 %v3410_v42  ;;  %v1547_v58 = vsel %vm1230_vm3, %v4203_v4, %v3593_v52  ;;  %3451 = vmatprep.subr.bf16.mxu0 %v3450_v43  ;;  %v2696_v4 = vld [vmem:[%s4832_s12 + $0x3f8] sm:$0xff]  ;;  %v2723_v42 = vld [vmem:[%s4832_s12 + $0x4c0] sm:$0xff]  ;;  %v2724_v43 = vld [vmem:[%s4832_s12 + $0x4c8] sm:$0xff]  ;;  %v3428_v50 = vpack.c.bf16 %v2684_v37, %v2683_v32 }
 0x44a   : > { %1765 = vmatprep.mubr.f32.mxu1 %v1547_v58  ;;  %v3418_v7 = vpack.c.bf16 %v2696_v4, %v2695_v60  ;;  %v3468_v51 = vpack.c.bf16 %v2724_v43, %v2723_v42  ;;  %v2685_v52 = vld [vmem:[%s4832_s12 + $0x3a0] sm:$0xff]  ;;  %v2726_v58 = vld [vmem:[%s4832_s12 + $0x4d8] sm:$0xff]  ;;  %v2744_v60 = vld [vmem:[%s4832_s12 + $0x568] sm:$0xff] }
 0x44b   : > { %3232 = vmatmul.mubr.msk.f32.vlgmr.msra.gmra.mrb[60].mxu0 %vm1230_vm3, %v4206_v9  ;;  %v2719_v9 = vld [vmem:[%s4832_s12 + $0x4a0] sm:$0xff]  ;;  %v3472_v2 = vpack.c.bf16 %v2726_v58, %v2725_v57  ;;  %v2750_v47 = vld [vmem:[%s4832_s12 + $0x598] sm:$0xff]  ;;  %v2780_v32 = vld [vmem:[%s4832_s12 + $0x688] sm:$0xff] }
 0x44c   : > { %3413 = vmatpush3.bf16.msra.mxu1 %v3412_v53  ;;  %3453 = vmatpush3.bf16.msra.mxu0 %v3452_v54  ;;  %v3460_v20 = vpack.c.bf16 %v2720_v56, %v2719_v9  ;;  %v2686_v53 = vld [vmem:[%s4832_s12 + $0x3a8] sm:$0xff]  ;;  %v3430_v54 = vpack.c.bf16 %v2702_v45, %v2701_v44  ;;  %v2745_v56 = vld [vmem:[%s4832_s12 + $0x570] sm:$0xff]  ;;  %v3488_v43 = vpack.c.bf16 %v2750_v47, %v2749_v34  ;;  %v2751_v44 = vld [vmem:[%s4832_s12 + $0x5a0] sm:$0xff] }
 0x44d   : > { %3415 = vmatprep.subr.bf16.mxu1 %v3414_v39  ;;  %3455 = vmatprep.subr.bf16.mxu0 %v3454_v15  ;;  %v2703_v39 = vld [vmem:[%s4832_s12 + $0x430] sm:$0xff]  ;;  %v3432_v63 = vpack.c.bf16 %v2686_v53, %v2685_v52  ;;  %v2728_v9 = vld [vmem:[%s4832_s12 + $0x4e8] sm:$0xff] }
 0x44e   : > { %v3434_v6 = vpack.c.bf16 %v2704_v0, %v2703_v39  ;;  %v2768_v42 = vld [vmem:[%s4832_s12 + $0x628] sm:$0xff]  ;;  %v2781_v49 = vld [vmem:[%s4832_s12 + $0x690] sm:$0xff]  ;;  %v2754_v0 = vld [vmem:[%s4832_s12 + $0x5b8] sm:$0xff] }
 0x44f   : > { %v2769_v53 = vld [vmem:[%s4832_s12 + $0x630] sm:$0xff] }
 0x450   : > { %3417 = vmatpush3.bf16.msra.mxu1 %v3416_v3  ;;  %3457 = vmatpush3.bf16.msra.mxu0 %v3456_v5  ;;  %v2687_v3 = vld [vmem:[%s4832_s12 + $0x3b0] sm:$0xff]  ;;  %v2688_v5 = vld [vmem:[%s4832_s12 + $0x3b8] sm:$0xff] }
 0x451   : > { %3419 = vmatprep.subr.bf16.mxu1 %v3418_v7  ;;  %3459 = vmatprep.subr.bf16.mxu0 %v3458_v8  ;;  %v3474_v7 = vpack.c.bf16 %v2744_v60, %v2743_v59  ;;  %v2727_v8 = vld [vmem:[%s4832_s12 + $0x4e0] sm:$0xff]  ;;  %v3436_v16 = vpack.c.bf16 %v2688_v5, %v2687_v3  ;;  %v2753_v58 = vld [vmem:[%s4832_s12 + $0x5b0] sm:$0xff]  ;;  %v2784_v60 = vld [vmem:[%s4832_s12 + $0x6a8] sm:$0xff] }
 0x452   : > { %v3476_v17 = vpack.c.bf16 %v2728_v9, %v2727_v8  ;;  %v2783_v59 = vld [vmem:[%s4832_s12 + $0x6a0] sm:$0xff]  ;;  %v2773_v8 = vld [vmem:[%s4832_s12 + $0x650] sm:$0xff]  ;;  %v2774_v9 = vld [vmem:[%s4832_s12 + $0x658] sm:$0xff] }
 0x453   : > { %v3521_v3 = vpack.c.bf16 %v2784_v60, %v2783_v59 }
 0x454   : > { %3421 = vmatpush3.bf16.msra.mxu1 %v3420_v18  ;;  %3461 = vmatpush3.bf16.msra.mxu0 %v3460_v20  ;;  %v2729_v18 = vld [vmem:[%s4832_s12 + $0x4f0] sm:$0xff]  ;;  %v3478_v20 = vpack.c.bf16 %v2746_v10, %v2745_v56 }
 0x455   : > { %3423 = vmatprep.subr.bf16.mxu1 %v3422_v24  ;;  %3463 = vmatprep.subr.bf16.mxu0 %v3462_v25  ;;  %v2747_v24 = vld [vmem:[%s4832_s12 + $0x580] sm:$0xff]  ;;  %v2748_v25 = vld [vmem:[%s4832_s12 + $0x588] sm:$0xff]  ;;  %v3480_v30 = vpack.c.bf16 %v2730_v22, %v2729_v18 }
 0x456   : > { %v3484_v33 = vpack.c.bf16 %v2748_v25, %v2747_v24  ;;  %v2776_v18 = vld [vmem:[%s4832_s12 + $0x668] sm:$0xff]  ;;  %v2759_v22 = vld [vmem:[%s4832_s12 + $0x5e0] sm:$0xff]  ;;  %v2777_v24 = vld [vmem:[%s4832_s12 + $0x670] sm:$0xff] }
 0x457   : > { %v2778_v25 = vld [vmem:[%s4832_s12 + $0x678] sm:$0xff] }
 0x458   : > { %3425 = vmatpush3.bf16.msra.mxu1 %v3424_v35  ;;  %3465 = vmatpush3.bf16.msra.mxu0 %v3464_v36  ;;  %v3486_v35 = vpack.c.bf16 %v2766_v29, %v2765_v28  ;;  %v2779_v36 = vld [vmem:[%s4832_s12 + $0x680] sm:$0xff]  ;;  %v3510_v28 = vpack.c.bf16 %v2778_v25, %v2777_v24  ;;  %v2761_v29 = vld [vmem:[%s4832_s12 + $0x5f0] sm:$0xff] }
 0x459   : > { %3427 = vmatprep.subr.bf16.mxu1 %v3426_v38  ;;  %3467 = vmatprep.subr.bf16.mxu0 %v3466_v40  ;;  %v1546_v38 = vsel %vm1230_vm3, %v4201_v61, %v3594_v27  ;;  %v2767_v40 = vld [vmem:[%s4832_s12 + $0x620] sm:$0xff]  ;;  %v3515_v45 = vpack.c.bf16 %v2780_v32, %v2779_v36  ;;  %v2752_v61 = vld [vmem:[%s4832_s12 + $0x5a8] sm:$0xff]  ;;  %v2326_v25 = vld [vmem:[%s4837_s17 + $0x30] sm:$0xff] }
 0x45a   : > { %v4564_v15 = vpop.permute.xlu1 %3596  ;;  %v3490_v46 = vpack.c.bf16 %v2768_v42, %v2767_v40  ;;  %v3492_v57 = vpack.c.bf16 %v2752_v61, %v2751_v44  ;;  %v2324_v24 = vld [vmem:[%s4837_s17 + $0x20] sm:$0xff] }
 0x45b   : > { %v3598_v4 = vunpack.i.l.bf16 %v4564_v15  ;;  %v3599_v37 = vunpack.i.h.bf16 %v4564_v15 }
 0x45c   : > { %3429 = vmatpush3.bf16.msra.mxu1 %v3428_v50  ;;  %3469 = vmatpush3.bf16.msra.mxu0 %v3468_v51  ;;  %v2782_v50 = vld [vmem:[%s4832_s12 + $0x698] sm:$0xff] }
 0x45d   : > { %3431 = vmatprep.subr.bf16.mxu1 %v3430_v54  ;;  %3471 = vmatprep.subr.bf16.mxu0 %v3470_v55  ;;  %v1860_v23 = vsel %vm1230_vm3, %v4210_v19, %v3598_v4  ;;  %v2763_v19 = vld [vmem:[%s4832_s12 + $0x600] sm:$0xff]  ;;  %v1859_v51 = vsel %vm1230_vm3, %v4208_v13, %v3599_v37  ;;  %v2770_v54 = vld [vmem:[%s4832_s12 + $0x638] sm:$0xff]  ;;  %v3518_v13 = vpack.c.bf16 %v2782_v50, %v2781_v49  ;;  %v2772_v4 = vld [vmem:[%s4832_s12 + $0x648] sm:$0xff] }
 0x45e   : > { %2010 = vmatprep.mubr.f32.mxu0 %v1860_v23  ;;  %v3482_v21 = vpack.c.bf16 %v2764_v48, %v2763_v19  ;;  %v3494_v15 = vpack.c.bf16 %v2770_v54, %v2769_v53  ;;  %v2756_v23 = vld [vmem:[%s4832_s12 + $0x5c8] sm:$0xff]  ;;  %v3502_v19 = vpack.c.bf16 %v2774_v9, %v2773_v8  ;;  %v2757_v48 = vld [vmem:[%s4832_s12 + $0x5d0] sm:$0xff] }
 0x460   : > { %3433 = vmatpush3.bf16.msra.mxu1 %v3432_v63  ;;  %3473 = vmatpush3.bf16.msra.mxu0 %v3472_v2  ;;  %v3496_v63 = vpack.c.bf16 %v2754_v0, %v2753_v58  ;;  %v2755_v2 = vld [vmem:[%s4832_s12 + $0x5c0] sm:$0xff] }
 0x461   : > { %3435 = vmatprep.subr.bf16.mxu1 %v3434_v6  ;;  %3475 = vmatprep.subr.bf16.mxu0 %v3474_v7  ;;  %v2785_v6 = vld [vmem:[%s4832_s12 + $0x6b0] sm:$0xff]  ;;  %v2786_v7 = vld [vmem:[%s4832_s12 + $0x6b8] sm:$0xff]  ;;  %v3500_v56 = vpack.c.bf16 %v2756_v23, %v2755_v2 }
 0x462   : > { %v3524_v10 = vpack.c.bf16 %v2786_v7, %v2785_v6 }
 0x464   : > { %3437 = vmatpush3.bf16.msra.mxu1 %v3436_v16  ;;  %3477 = vmatpush3.bf16.msra.mxu0 %v3476_v17  ;;  %v2758_v16 = vld [vmem:[%s4832_s12 + $0x5d8] sm:$0xff]  ;;  %v2775_v17 = vld [vmem:[%s4832_s12 + $0x660] sm:$0xff] }
 0x465   : > { %3479 = vmatprep.subr.bf16.mxu0 %v3478_v20  ;;  %3483 = vmatprep.subr.bf16.mxu1 %v3482_v21  ;;  %v3504_v20 = vpack.c.bf16 %v2758_v16, %v2757_v48  ;;  %v3506_v21 = vpack.c.bf16 %v2776_v18, %v2775_v17  ;;  %v2323_v48 = vld [vmem:[%s4837_s17 + $0x18] sm:$0xff]  ;;  %v2320_v16 = vld [vmem:[%s4837_s17] sm:$0xff]  ;;  %v2322_v18 = vld [vmem:[%s4837_s17 + $0x10] sm:$0xff] }
 0x467   : > { %1766 = vmatmul.mubr.f32.vlgmr.msra.gmra.mrb[8].mxu1 %v1546_v38 }
 0x468   : > { %3481 = vmatpush3.bf16.msra.mxu0 %v3480_v30  ;;  %3485 = vmatpush3.bf16.msra.mxu1 %v3484_v33  ;;  %v2762_v30 = vld [vmem:[%s4832_s12 + $0x5f8] sm:$0xff] }
 0x469   : > { %3487 = vmatprep.subr.bf16.mxu1 %v3486_v35  ;;  %3514 = vmatprep.subr.bf16.mxu0 %v3634_v62  ;;  %v3512_v33 = vpack.c.bf16 %v2762_v30, %v2761_v29  ;;  %v3532_v29 = vpack.c.bf16 %v2326_v25, %v2324_v24 }
 0x46a   : > { %v4657_v52 = vpop.permute.xlu0 %3601 }
 0x46b   : > { %2011 = vmatmul.mubr.f32.vlgmr.msra.gmra.mrb[62].mxu0 %v1859_v51  ;;  %v3603_v55 = vunpack.i.l.bf16 %v4657_v52  ;;  %v3604_v34 = vunpack.i.h.bf16 %v4657_v52  ;;  %v1311_v37 = vpop.permute.xlu1 %1310 }
 0x46c   : > { %3489 = vmatpush3.bf16.msra.mxu1 %v3488_v43  ;;  %3516 = vmatpush3.bf16.msra.mxu0 %v3515_v45 }
 0x46d   : > { %3491 = vmatprep.subr.bf16.mxu1 %v3490_v46  ;;  %v1862_v39 = vsel %vm1230_vm3, %v4221_v31, %v3603_v55  ;;  %3517 = vmatprep.subr.bf16.mxu0 %v3634_v62  ;;  %v2771_v31 = vld [vmem:[%s4832_s12 + $0x640] sm:$0xff] }
 0x46e   : > { %2080 = vmatprep.mubr.f32.mxu1 %v1862_v39  ;;  %3250 = vmatprep.mubr.msk.f32.mxu0 %vm3635_vm1, %v3632_v1  ;;  %v3498_v5 = vpack.c.bf16 %v2772_v4, %v2771_v31 }
 0x470   : > { %3493 = vmatpush3.bf16.msra.mxu1 %v3492_v57  ;;  %3519 = vmatpush3.bf16.msra.mxu0 %v3518_v13 }
 0x471   : > { %3495 = vmatprep.subr.bf16.mxu1 %v3494_v15  ;;  %3520 = vmatprep.subr.bf16.mxu0 %v3634_v62 }
 0x474   : > { %3497 = vmatpush3.bf16.msra.mxu1 %v3496_v63  ;;  %3522 = vmatpush3.bf16.msra.mxu0 %v3521_v3  ;;  %v1941_v3 = vpop.permute.xlu1 %1940 }
 0x475   : > { %3499 = vmatprep.subr.bf16.mxu1 %v3498_v5  ;;  %3523 = vmatprep.subr.bf16.mxu0 %v3634_v62  ;;  %v2760_v62 = vld [vmem:[%s4832_s12 + $0x5e8] sm:$0xff] }
 0x476   : > { %v3508_v27 = vpack.c.bf16 %v2760_v62, %v2759_v22  ;;  %v3528_v22 = vpack.c.bf16 %v2322_v18, %v2320_v16 }
 0x478   : > { %3501 = vmatpush3.bf16.msra.mxu1 %v3500_v56  ;;  %3525 = vmatpush3.bf16.msra.mxu0 %v3524_v10  ;;  %v2158_v10 = vld [vmem:[%s4833_s13] sm:$0xff] }
 0x479   : > { %3503 = vmatprep.subr.bf16.mxu1 %v3502_v19  ;;  %v2321_v19 = vld [vmem:[%s4837_s17 + $0x8] sm:$0xff] }
 0x47a   : > { %v3526_v17 = vpack.c.bf16 %v2323_v48, %v2321_v19 }
 0x47b   : > { %3251 = vmatmul.mubr.msk.f32.vlgmr.msra.gmra.mrb[64].mxu0 %vm1230_vm3, %v4233_v41  ;;  %v1861_v41 = vsel %vm1230_vm3, %v4216_v26, %v3604_v34  ;;  %v1626_v53 = vpop.permute.xlu0 %1625  ;;  %v2330_v34 = vld [vmem:[%s4837_s17 + $0x50] sm:$0xff] }
 0x47c   : > { %3505 = vmatpush3.bf16.msra.mxu1 %v3504_v20  ;;  %2403 = vmatprep.mubr.f32.mxu0 %v3632_v1  ;;  %v2325_v20 = vld [vmem:[%s4837_s17 + $0x28] sm:$0xff] }
 0x47d   : > { %3507 = vmatprep.subr.bf16.mxu1 %v3506_v21  ;;  %v2327_v21 = vld [vmem:[%s4837_s17 + $0x38] sm:$0xff]  ;;  %3527 = vmatprep.subr.bf16.mxu0 %v3526_v17 }
 0x47e   : > { %v3530_v62 = vpack.c.bf16 %v2327_v21, %v2325_v20  ;;  %3529 = vmatpush1.bf16.msra.mxu0 %v3528_v22 }
 0x480   : > { %3509 = vmatpush3.bf16.msra.mxu1 %v3508_v27  ;;  %3531 = vmatprep.subr.bf16.mxu0 %v3530_v62  ;;  %v2329_v27 = vld [vmem:[%s4837_s17 + $0x48] sm:$0xff] }
 0x481   : > { %3511 = vmatprep.subr.bf16.mxu1 %v3510_v28  ;;  %v2331_v28 = vld [vmem:[%s4837_s17 + $0x58] sm:$0xff] }
 0x482   : > { %v3534_v30 = vpack.c.bf16 %v2331_v28, %v2329_v27  ;;  %3533 = vmatpush1.bf16.msra.mxu0 %v3532_v29 }
 0x484   : > { %3513 = vmatpush3.bf16.msra.mxu1 %v3512_v33  ;;  %v2328_v33 = vld [vmem:[%s4837_s17 + $0x40] sm:$0xff]  ;;  %3535 = vmatprep.subr.bf16.mxu0 %v3534_v30 }
 0x485   : > { %3253 = vmatprep.subr.mxu1 %v3632_v1 }
 0x487   : > { %2081 = vmatmul.mubr.f32.vlgmr.msra.gmra.mrb[10].mxu1 %v1861_v41  ;;  %v2333_v41 = vld [vmem:[%s4837_s17 + $0x68] sm:$0xff] }
 0x488   : > { %3255 = vmatprep.mubr.msk.f32.mxu1 %vm3635_vm1, %v3632_v1 }
 0x4ea   : > { %v2897_v35 = vpop.f32.mrb[2].mxu1 }
 0x4eb   : > { %v2898_v47 = vpop.f32.mrb[3].mxu1 }
 0x4ec   : > { %v2899_v36 = vadd.f32 %v2898_v47, %v2897_v35  ;;  %v2335_v35 = vld [vmem:[%s4837_s17 + $0x78] sm:$0xff]  ;;  %v3536_v47 = vpack.c.bf16 %v2330_v34, %v2328_v33 }
 0x4ee   : > { %v1383_v40 = vadd.f32 %v2899_v36, %v1311_v37  ;;  %v3538_v36 = vpack.c.bf16 %v2335_v35, %v2333_v41  ;;  %v2334_v37 = vld [vmem:[%s4837_s17 + $0x70] sm:$0xff]  ;;  %3537 = vmatpush1.bf16.msra.mxu0 %v3536_v47 }
 0x4f0   : > { %3539 = vmatprep.subr.bf16.mxu0 %v3538_v36 }
 0x50a   : > { %v2932_v32 = vpop.f32.mrb[4].mxu1 }
 0x50b   : > { %v2933_v38 = vpop.f32.mrb[5].mxu1 }
 0x50c   : > { %v2934_v42 = vadd.f32 %v2933_v38, %v2932_v32  ;;  %v2332_v32 = vld [vmem:[%s4837_s17 + $0x60] sm:$0xff] }
 0x50d   : > { %v3540_v38 = vpack.c.bf16 %v2334_v37, %v2332_v32 }
 0x50e   : > { %v2976_v43 = vpop.f32.mrb[58].mxu0  ;;  %v1453_v44 = vadd.f32 %v2934_v42, %v1383_v40  ;;  %v2163_v40 = vpop.permute.xlu0 %2162 }
 0x50f   : > { %v2977_v45 = vpop.f32.mrb[59].mxu0  ;;  %3541 = vmatpush1.bf16.msra.mxu0 %v3540_v38 }
 0x510   : > { %v2978_v46 = vadd.f32 %v2977_v45, %v2976_v43 }
 0x512   : > { %v1698_v55 = vadd.f32 %v2978_v46, %v1626_v53  ;;  %v2239_v46 = vld [vmem:[%s4835_s15] sm:$0x7f] }
 0x51a   : > { %v1522_v61 = vpop.f32.mrb[6].mxu1 }
 0x51b   : > { %v1523_v49 = vadd.f32 %v1522_v61, %v1453_v44  ;;  %v3214_v50 = vpop.f32.mrb[7].mxu1  ;;  %v2244_v61 = vpop.permute.xlu1 %2243 }
 0x51d   : > { %v1526_v59 = vmax.f32 %v1523_v49, 0.0 }
 0x51e   : > { %v1837_v26 = vpop.f32.mrb[60].mxu0 }
 0x51f   : > { %v3233_v51 = vpop.f32.mrb[61].mxu0 }
 0x53a   : > { %v3011_v52 = vpop.f32.mrb[8].mxu1 }
 0x53b   : > { %v3012_v54 = vpop.f32.mrb[9].mxu1 }
 0x53c   : > { %v3013_v57 = vadd.f32 %v3012_v54, %v3011_v52  ;;  %v3637_v54 = vmov 1966171168  }
 0x53e   : > { %v1768_v58 = vadd.f32 %v3013_v57, %v1698_v55  ;;  %v3055_v13 = vpop.f32.mrb[62].mxu0  ;;  %v2489_v55 = vunpack.c.l.s4 %v3637_v54 }
 0x53f   : > { %v3056_v39 = vpop.f32.mrb[63].mxu0 }
 0x540   : > { %v1838_v15 = vadd.f32 %v1837_v26, %v1768_v58  ;;  %v3057_v0 = vadd.f32 %v3056_v39, %v3055_v13  ;;  %v2490_v57 = vunpack.c.0.s8 %v2489_v55 }
 0x542   : > { %v1841_v60 = vmax.f32 %v1838_v15, 0.0  ;;  %v2013_v23 = vadd.f32 %v3057_v0, %v1941_v3  ;;  %v2493_v58 = vsub.s32 %v2490_v57, %v3819_v12 }
 0x544   : > { %v1842_v31 = vadd.f32 %v1841_v60, %v1526_v59 }
 0x54e   : > { %v2152_v4 = vpop.f32.mrb[64].mxu0 }
 0x54f   : > { %v3252_v63 = vpop.f32.mrb[65].mxu0 }
 0x55a   : > { %v3090_v2 = vpop.f32.mrb[10].mxu1 }
 0x55b   : > { %v3091_v5 = vpop.f32.mrb[11].mxu1 }
 0x55c   : > { %v3092_v6 = vadd.f32 %v3091_v5, %v3090_v2 }
 0x55e   : > { %v2083_v7 = vadd.f32 %v3092_v6, %v2013_v23 }
 0x560   : > { %v2153_v8 = vadd.f32 %v2152_v4, %v2083_v7 }
 0x562   : > { %v2156_v9 = vmax.f32 %v2153_v8, 0.0 }
 0x564   : > { %v2157_v56 = vadd.f32 %v2156_v9, %v1842_v31 }
 0x566   : > { %3254 = vmatpush3.msra.mxu1 %v2157_v56 }
 0x567   : > { %3256 = vmatmul.mubr.msk.f32.vlgmr.msra.gmra.mrb[12].mxu1 %vm623_vm0, %v2158_v10  ;;  %3258 = vmatprep.subr.mxu1 %v3632_v1 }
 0x568   : > { %3260 = vmatprep.mubr.msk.f32.mxu1 %vm3635_vm1, %v3632_v1 }
 0x63a   : > { %v2234_v42 = vpop.f32.mrb[12].mxu1 }
 0x63b   : > { %v2235_v43 = vadd.f32 %v2234_v42, %v2163_v40  ;;  %v3257_v44 = vpop.f32.mrb[13].mxu1 }
 0x63d   : > { %v2238_v45 = vmax.f32 %v2235_v43, 0.0 }
 0x63f   : > { %3259 = vmatpush3.msra.mxu1 %v2238_v45 }
 0x640   : > { %3261 = vmatmul.mubr.msk.f32.vlgmr.msra.gmra.mrb[14].mxu1 %vm623_vm0, %v2239_v46  ;;  %3543 = vmatprep.subr.bf16.mxu1 %v3526_v17 }
 0x641   : > { %3545 = vmatpush1.bf16.msra.mxu1 %v3528_v22  ;;  %2476 = vmatprep.mubr.f32.mxu1 %v3632_v1 }
 0x642   : > { %3547 = vmatprep.subr.bf16.mxu1 %v3530_v62 }
 0x645   : > { %3549 = vmatpush1.bf16.msra.mxu1 %v3532_v29 }
 0x646   : > { %3551 = vmatprep.subr.bf16.mxu1 %v3534_v30 }
 0x649   : > { %3553 = vmatpush1.bf16.msra.mxu1 %v3536_v47 }
 0x64a   : > { %3555 = vmatprep.subr.bf16.mxu1 %v3538_v36 }
 0x64d   : > { %3557 = vmatpush1.bf16.msra.mxu1 %v3540_v38 }
 0x650   : > { %2792 = vmatmul.mubr.msk.f32.vlgmr.msra.gmra.mrb[16].mxu1 %vm1230_vm3, %v3822_v14 }
 0x713   : > { %v2315_v49 = vpop.f32.mrb[14].mxu1 }
 0x714   : > { %v2316_v50 = vadd.f32 %v2315_v49, %v2244_v61  ;;  %v3262_v26 = vpop.f32.mrb[15].mxu1 }
 0x716   : > { %v2319_v51 = vmax.f32 %v2316_v50, 0.0 }
 0x718   : > { %2791 = vmatmul.mubr.msk.f32.vlgmr.msra.gmra.mrb[66].mxu0 %vm1230_vm3, %v2319_v51 }
 0x723   : > { %v2478_v52 = vpop.f32.mrb[16].mxu1 }
 0x724   : > { %v2480_v53 = vpop.f32.mrb[17].mxu1 }
 0x725   : > { %v2487_v1 = vcombine.low %v2478_v52, %v2480_v53 }
 0x727   : > { %v2494_v13 = vrot.slane %v2487_v1, %v2493_v58 }
 0x729   : > { %v2501_v39 = vrot.slane %v2494_v13, %v2493_v58 }
 0x72b   : > { %2793 = vst.msk [vmem:[%s613_s23 + $0x7] ss:$8 sm:$0x3] %vm2505_vm4, %v2501_v39 }
 0x7eb   : > { %v2405_v14 = vpop.f32.mrb[66].mxu0 }
 0x7ec   : > { %2483 = vst [vmem:[%s613_s23] sm:$0x7f] %v2405_v14  ;;  %v2407_v15 = vpop.f32.mrb[67].mxu0 }
 0x7ed   : > { %2484 = vst [vmem:[%s613_s23 + $0x8] sm:$0x7f] %v2407_v15 }
 0x7ee PF: > { %s34_s19 = sadd.s32 1, %s3629_s19  }
 0x7ef   : > { %p31_p10 = scmp.ge.s32.totalorder %s34_s19, 6  }
 0x7f1   :  { %33 = sbr.rel (!%p31_p10) target bundleno = 23 (0x17), region = 132 }

</bundles_post_ra>
